<compile_context>
chip_gen: v7x
topology: tpu7x:2x2x1
jax: 0.10.0
libtpu: 0.0.40
codegen_flags: <defaults>
</compile_context>

<pallas_src>
import numpy as np

import jax
import jax.numpy as jnp
from jax.experimental import pallas as pl
from jax.experimental.pallas import tpu as pltpu

BN_EPS = 1e-5          # PyTorch BatchNorm1d default eps
LEAKY_SLOPE = 0.2      # LeakyReLU(0.2)


def _round_up(n, m):
    return -(-int(n) // m) * m


# ----------------------------------------------------------------------------
# Pallas kernel
# ----------------------------------------------------------------------------
def make_tcn_kernel(meta, batch_block, lp):
    """Kernel body.  All offsets / shapes below are static Python ints."""
    K = meta["kernel_size"]
    il = meta["int_length"]
    mats = meta["mats"]                 # [(row_off, rows, cols)] into the weight slab
    conv_layers = meta["conv"]          # [(tap_mat_ids, scale_row, shift_row, dilation)]
    lin0_taps, lin0_bias = meta["lin0"]  # ([mat_id per time step], bias_row)
    lin_rest = meta["lin"]              # [(mat_id, bias_row, is_last)]
    cdtype = jnp.bfloat16 if meta["use_bf16"] else jnp.float32

    def wslice(w_ref, mi):
        off, rin, cols = mats[mi]
        return w_ref[off:off + rin, :cols]

    def kernel(x_ref, w_ref, v_ref, s_ref, out_ref):
        # Activations: rows = (sample-in-block, time), channels on lanes.
        # Weights are shared across the batch block (no block-diagonal blowup).
        h = x_ref[0].astype(jnp.float32)                       # (Bb*lp, c_in)
        rows = batch_block * lp

        # ---- dilated Conv1d + folded BN + LeakyReLU: K accumulating MXU dots ----
        for (taps, sr, hr, d) in conv_layers:
            rows = rows - (K - 1) * d                          # 'valid' rows we keep
            hb = h.astype(cdtype)
            _, _, cols = mats[taps[0]]
            acc = jnp.dot(hb[0:rows, :], wslice(w_ref, taps[0]),
                          preferred_element_type=jnp.float32)
            for j in range(1, K):
                acc = acc + jnp.dot(hb[j * d:j * d + rows, :], wslice(w_ref, taps[j]),
                                    preferred_element_type=jnp.float32)
            y = acc * v_ref[sr:sr + 1, :cols] + v_ref[hr:hr + 1, :cols]   # folded BN+bias
            h = jnp.where(y > 0.0, y, LEAKY_SLOPE * y)         # LeakyReLU(0.2)

        # ---- Flatten + first Linear == int_length accumulating dots over time ----
        rows_z = rows - (il - 1)
        hb = h.astype(cdtype)
        _, _, h1c = mats[lin0_taps[0]]
        z = jnp.dot(hb[0:rows_z, :], wslice(w_ref, lin0_taps[0]),
                    preferred_element_type=jnp.float32)
        for t in range(1, il):
            z = z + jnp.dot(hb[t:t + rows_z, :], wslice(w_ref, lin0_taps[t]),
                            preferred_element_type=jnp.float32)

        # Row b*lp of z holds sample b's features; gather the Bb rows with one tiny
        # selection matmul (keeps the MLP compact; avoids cross-sublane gathers).
        feat = jnp.dot(s_ref[...], z, preferred_element_type=jnp.float32)  # (Bb, H1p)
        feat = jnp.maximum(feat + v_ref[lin0_bias:lin0_bias + 1, :h1c], 0.0)

        # ---- remaining Linear layers (weights shared across the batch block) ----
        for (mi, br, is_last) in lin_rest:
            _, _, cols = mats[mi]
            feat = jnp.dot(feat.astype(cdtype), wslice(w_ref, mi),
                           preferred_element_type=jnp.float32) + v_ref[br:br + 1, :cols]
            if not is_last:
                feat = jnp.maximum(feat, 0.0)                  # ReLU

        # Lane-dense store: (Bb, 128); only column 0 is the real logit.
        out_ref[0] = jax.nn.sigmoid(feat)

    return kernel


def _estimate_cost(meta, Bb, lp, G, in_bytes, w_bytes, v_bytes, s_bytes, out_bytes):
    K, il, mats = meta["kernel_size"], meta["int_length"], meta["mats"]
    flops = 0
    rows = Bb * lp
    for (taps, _, _, d) in meta["conv"]:
        rows -= (K - 1) * d
        for mi in taps:
            _, rin, cols = mats[mi]
            flops += 2 * rows * rin * cols
    rows_z = rows - (il - 1)
    lin0_taps, _ = meta["lin0"]
    for mi in lin0_taps:
        _, rin, cols = mats[mi]
        flops += 2 * rows_z * rin * cols
    _, _, h1c = mats[lin0_taps[0]]
    flops += 2 * Bb * rows_z * h1c                              # selection gather
    for (mi, _, _) in meta["lin"]:
        _, rin, cols = mats[mi]
        flops += 2 * Bb * rin * cols
    flops *= G
    trans = G * Bb * meta["out_cols"]                           # sigmoid
    return pl.CostEstimate(flops=int(flops), transcendentals=int(trans),
                           bytes_accessed=int(in_bytes + w_bytes + v_bytes
                                               + s_bytes + out_bytes))


def tcn_discriminator_forward(x, packed, batch_block=None):
    """x: (B, T, C) float32 — same input layout the PyTorch module expects.

    batch_block: samples handled per grid step.  Packed weights are independent of it,
    so pick batch_block=B (G=1) on v5e/v6e and batch_block=B//2 (G=2) on v7x."""
    w_slab, v_slab, meta = packed["w_slab"], packed["v_slab"], packed["meta"]
    batch, seq_len, c_in = x.shape
    assert c_in == meta["in_channels"], "channel mismatch"
    K, il = meta["kernel_size"], meta["int_length"]

    l = seq_len
    for (_, _, _, d) in meta["conv"]:
        l -= d * (K - 1)
    assert l == il, "seq_len inconsistent with int_length"

    Bb = batch if batch_block is None else int(batch_block)
    assert batch % Bb == 0, "batch must be divisible by batch_block"
    G = batch // Bb
    lp = _round_up(seq_len, 8)                  # per-sample rows, sublane aligned
    R = Bb * lp
    rows_z = R - seq_len + 1                    # rows surviving conv + first-linear shifts

    # (B, T, C) -> (G, Bb*lp, C): pad time to lp, stack block samples on sublanes.
    xp = jnp.pad(x, ((0, 0), (0, lp - seq_len), (0, 0)))
    xg = xp.reshape(G, R, c_in)

    # Selection matrix: row b of the result picks feature row b*lp.
    s_np = np.zeros((Bb, rows_z), np.float32)
    s_np[np.arange(Bb), np.arange(Bb) * lp] = 1.0
    s_mat = jnp.asarray(s_np)

    out_cols = meta["out_cols"]
    cost = _estimate_cost(meta, Bb, lp, G,
                          xg.size * 4,
                          w_slab.size * w_slab.dtype.itemsize,
                          v_slab.size * 4, s_mat.size * 4,
                          G * Bb * out_cols * 4)

    out = pl.pallas_call(
        make_tcn_kernel(meta, Bb, lp),
        out_shape=jax.ShapeDtypeStruct((G, Bb, out_cols), jnp.float32),
        grid=(G,),
        in_specs=[
            pl.BlockSpec((1, R, c_in), lambda i: (i, 0, 0)),     # per-block activations
            pl.BlockSpec(w_slab.shape, lambda i: (0, 0)),        # packed weight slab
            pl.BlockSpec(v_slab.shape, lambda i: (0, 0)),        # packed vector slab
            pl.BlockSpec(s_mat.shape, lambda i: (0, 0)),         # row-selection matrix
        ],
        out_specs=pl.BlockSpec((1, Bb, out_cols), lambda i: (i, 0, 0)),
        compiler_params=pltpu.CompilerParams(
            dimension_semantics=("parallel",)),                  # v7x: blocks across TCs
        cost_estimate=cost,
    )(xg, w_slab, v_slab, s_mat)

    return out[:, :, 0].reshape(batch, 1)


# ----------------------------------------------------------------------------
# Host-side parameter preparation: PyTorch layout -> packed kernel slabs.
# Packing is independent of the batch block (weights are shared across samples).
# ----------------------------------------------------------------------------
def pack_tcn_params(tp, kernel_size, int_length, use_bf16=False):
    K, il = int(kernel_size), int(int_length)
    row_align = 16 if use_bf16 else 8
    slab_dtype = jnp.bfloat16 if use_bf16 else jnp.float32

    mats, vecs = [], []

    def add_mat(m):
        mats.append(np.asarray(m, np.float32))
        return len(mats) - 1

    def add_vec(v, width):
        out = np.zeros((width,), np.float32)
        v = np.asarray(v, np.float32).reshape(-1)
        out[:v.shape[0]] = v
        vecs.append(out)
        return len(vecs) - 1

    # --- conv layers: per-tap (Ci, Co_pad) blocks, BN(+bias) folded to scale/shift ---
    conv_meta = []
    c_in = int(np.asarray(tp["conv"][0]["w"]).shape[1])
    prev_real, prev_pad = c_in, c_in         # layer 0 contracts over the true c_in lanes
    for li, layer in enumerate(tp["conv"]):
        w = np.asarray(layer["w"], np.float32)           # (Co, Ci, K) PyTorch Conv1d
        co, ci, k = w.shape
        assert k == K and ci == prev_real
        co_pad = _round_up(co, 128)
        rin = prev_real if li == 0 else prev_pad
        taps = []
        for j in range(K):
            blk = np.zeros((rin, co_pad), np.float32)
            blk[:ci, :co] = w[:, :, j].T
            taps.append(add_mat(blk))
        scale = (np.asarray(layer["gamma"], np.float32)
                 / np.sqrt(np.asarray(layer["var"], np.float32) + BN_EPS))
        shift = (np.asarray(layer["beta"], np.float32)
                 + (np.asarray(layer["b"], np.float32)
                    - np.asarray(layer["mean"], np.float32)) * scale)
        conv_meta.append((taps, add_vec(scale, co_pad), add_vec(shift, co_pad),
                          int(layer["dilation"])))
        prev_real, prev_pad = co, co_pad

    # --- first Linear: one (Co_pad, H1_pad) block per time step of the Flatten ---
    lins = tp["lin"]
    W1 = np.asarray(lins[0]["w"], np.float32)            # (H1, Co*il), feature = c*il + t
    H1 = W1.shape[0]
    assert W1.shape[1] == prev_real * il
    h1_pad = _round_up(H1, 128)
    lin0_taps = []
    for t in range(il):
        blk = np.zeros((prev_pad, h1_pad), np.float32)
        blk[:prev_real, :H1] = W1[:, t::il].T            # columns c*il+t, c = 0..Co-1
        lin0_taps.append(add_mat(blk))
    lin0_bias = add_vec(lins[0]["b"], h1_pad)
    prev_real, prev_pad = H1, h1_pad

    # --- remaining Linear layers (hidden + final, final padded to 128 lanes) ---
    lin_meta = []
    for i in range(1, len(lins)):
        W = np.asarray(lins[i]["w"], np.float32)         # (out, in)
        fo, fi = W.shape
        assert fi == prev_real
        fo_pad = _round_up(fo, 128)
        blk = np.zeros((prev_pad, fo_pad), np.float32)
        blk[:fi, :fo] = W.T
        lin_meta.append((add_mat(blk), add_vec(lins[i]["b"], fo_pad),
                         i == len(lins) - 1))
        prev_real, prev_pad = fo, fo_pad
    out_cols = prev_pad

    # --- pack matrices into one slab: 128-multiple columns, dtype-aligned rows ---
    cmax = max(m.shape[1] for m in mats)
    mat_meta, chunks, off = [], [], 0
    for m in mats:
        r, c = m.shape
        rp = _round_up(r, row_align)
        blk = np.zeros((rp, cmax), np.float32)
        blk[:r, :c] = m
        chunks.append(blk)
        mat_meta.append((off, r, c))
        off += rp
    w_slab = jnp.asarray(np.concatenate(chunks, axis=0), dtype=slab_dtype)

    # --- pack vectors (BN scale/shift, biases) into a single f32 slab ---
    vmax = max(v.shape[0] for v in vecs)
    v_np = np.zeros((len(vecs), vmax), np.float32)
    for i, v in enumerate(vecs):
        v_np[i, :v.shape[0]] = v
    v_slab = jnp.asarray(v_np)

    meta = dict(kernel_size=K, int_length=il, in_channels=c_in,
                use_bf16=bool(use_bf16), out_cols=int(out_cols),
                conv=conv_meta, lin0=(lin0_taps, lin0_bias), lin=lin_meta,
                mats=mat_meta)
    return dict(w_slab=w_slab, v_slab=v_slab, meta=meta)


# ----------------------------------------------------------------------------
# Deterministic synthetic parameters (PyTorch layout) and a pure-JAX reference
# that mimics the PyTorch NCL forward exactly.
# ----------------------------------------------------------------------------
def init_params(key, in_channels, out_channels, kernel_size, n_layers,
                int_length, linear_channels):
    keys = iter(jax.random.split(key, 64))
    tp = {"conv": [], "lin": []}
    ni = in_channels
    for idx in range(1, n_layers + 1):
        d = 2 ** idx
        tp["conv"].append(dict(
            w=0.2 * jax.random.normal(next(keys), (out_channels, ni, kernel_size), jnp.float32),
            b=0.1 * jax.random.normal(next(keys), (out_channels,), jnp.float32),
            gamma=1.0 + 0.1 * jax.random.normal(next(keys), (out_channels,), jnp.float32),
            beta=0.1 * jax.random.normal(next(keys), (out_channels,), jnp.float32),
            mean=0.1 * jax.random.normal(next(keys), (out_channels,), jnp.float32),
            var=1.0 + 0.1 * jnp.abs(jax.random.normal(next(keys), (out_channels,), jnp.float32)),
            dilation=d))
        ni = out_channels
    dims = [int_length * out_channels] + list(linear_channels)
    for i in range(len(linear_channels)):
        tp["lin"].append(dict(
            w=jax.random.normal(next(keys), (dims[i + 1], dims[i]), jnp.float32)
              / jnp.sqrt(float(dims[i])),
            b=0.1 * jax.random.normal(next(keys), (dims[i + 1],), jnp.float32)))
    return tp


def reference_forward(x_btc, tp):
    x = jnp.transpose(x_btc, (0, 2, 1))                  # (B, C, T), like x.transpose(1,2)
    for layer in tp["conv"]:
        w, b, d = layer["w"], layer["b"], layer["dilation"]
        co, ci, k = w.shape
        l_out = x.shape[2] - d * (k - 1)
        out = jnp.zeros((x.shape[0], co, l_out), jnp.float32)
        for j in range(k):
            out = out + jnp.einsum("oc,bcl->bol", w[:, :, j],
                                   x[:, :, j * d: j * d + l_out])
        out = out + b[None, :, None]
        out = ((out - layer["mean"][None, :, None])
               / jnp.sqrt(layer["var"][None, :, None] + BN_EPS)
               * layer["gamma"][None, :, None] + layer["beta"][None, :, None])
        x = jnp.where(out > 0, out, LEAKY_SLOPE * out)
    h = x.reshape(x.shape[0], -1)                        # Flatten (C-major)
    for l in tp["lin"][:-1]:
        h = jnp.maximum(h @ l["w"].T + l["b"], 0.0)
    h = h @ tp["lin"][-1]["w"].T + tp["lin"][-1]["b"]
    return jax.nn.sigmoid(h)


if __name__ == "__main__":
    # Small-but-consistent TCNDiscriminator configuration:
    in_channels, out_channels, kernel_size = 6, 8, 2
    n_layers, int_length = 3, 6                          # dilations 2, 4, 8
    linear_channels = [32, 16, 8, 1]
    batch = 2
    dil_sum = sum(2 ** i for i in range(1, n_layers + 1))
    seq_len = int_length + (kernel_size - 1) * dil_sum   # 20 -> convs leave int_length steps

    key = jax.random.PRNGKey(0)
    kx, kp = jax.random.split(key)
    x = jax.random.normal(kx, (batch, seq_len, in_channels), jnp.float32)
    torch_params = init_params(kp, in_channels, out_channels, kernel_size,
                               n_layers, int_length, linear_channels)
    ref = reference_forward(x, torch_params)

    # (a) f32 weights, whole batch in one grid step (v5e/v6e: minimal grid overhead).
    packed_f32 = pack_tcn_params(torch_params, kernel_size, int_length, use_bf16=False)
    out_f32 = jax.block_until_ready(
        tcn_discriminator_forward(x, packed_f32, batch_block=batch))
    assert out_f32.shape == (batch, 1)
    assert bool(jnp.allclose(out_f32, ref, atol=1e-4, rtol=1e-4)), (out_f32, ref)

    # (b) same packed weights, batch split over 2 grid steps (v7x: one per TensorCore).
    out_mc = jax.block_until_ready(
        tcn_discriminator_forward(x, packed_f32, batch_block=1))
    assert bool(jnp.allclose(out_mc, ref, atol=1e-4, rtol=1e-4)), (out_mc, ref)

    # (c) bf16 weights / MXU operands, f32 accumulation + elementwise (v6e/v7x path).
    packed_bf16 = pack_tcn_params(torch_params, kernel_size, int_length, use_bf16=True)
    out_bf16 = jax.block_until_ready(
        tcn_discriminator_forward(x, packed_bf16, batch_block=batch))
    assert bool(jnp.allclose(out_bf16, ref, atol=3e-2)), (out_bf16, ref)

    print("KERNEL_OK")
</pallas_src>

<mosaic_0001>
module attributes {stable_mosaic.version = 11 : i64} {
  func.func @kernel(%arg0: i32, %arg1: memref<1x48x6xf32, #tpu.memory_space<vmem>>, %arg2: memref<1680x128xf32, #tpu.memory_space<vmem>>, %arg3: memref<10x128xf32, #tpu.memory_space<vmem>>, %arg4: memref<2x29xf32, #tpu.memory_space<vmem>>, %arg5: memref<1x2x128xf32, #tpu.memory_space<vmem>>) attributes {dimension_semantics = [#tpu.dimension_semantics<parallel>], iteration_bounds = array<i64: 1>, scalar_prefetch = 0 : i64, scratch_operands = 0 : i64, tpu.core_type = #tpu.core_type<tc>, window_params = [{transform_indices = @transform_0, window_bounds = array<i64: 1, 48, 6>}, {pipeline_mode = #tpu.pipeline_mode<synchronous>, transform_indices = @transform_1, window_bounds = array<i64: 1680, 128>}, {pipeline_mode = #tpu.pipeline_mode<synchronous>, transform_indices = @transform_2, window_bounds = array<i64: 10, 128>}, {pipeline_mode = #tpu.pipeline_mode<synchronous>, transform_indices = @transform_3, window_bounds = array<i64: 2, 29>}, {transform_indices = @transform_4, window_bounds = array<i64: 1, 2, 128>}]} {
    %c0 = arith.constant 0 : index
    %c0_0 = arith.constant 0 : index
    %c0_1 = arith.constant 0 : index
    %0 = vector.load %arg1[%c0, %c0_0, %c0_1] : memref<1x48x6xf32, #tpu.memory_space<vmem>>, vector<1x48x6xf32>
    %1 = vector.shape_cast %0 : vector<1x48x6xf32> to vector<48x6xf32>
    %2 = vector.extract_strided_slice %1 {offsets = [0, 0], sizes = [46, 6], strides = [1, 1]} : vector<48x6xf32> to vector<46x6xf32>
    %c0_2 = arith.constant 0 : index
    %c0_3 = arith.constant 0 : index
    %3 = vector.load %arg2[%c0_2, %c0_3] : memref<1680x128xf32, #tpu.memory_space<vmem>>, vector<6x128xf32>
    %cst = arith.constant dense<0.000000e+00> : vector<46x128xf32>
    %4 = tpu.matmul %2, %3, %cst {dimension_numbers = #tpu.dot_dimension_numbers<[1], [0], [0], [1], [0, 0, 1, 1], [], []>} : vector<46x6xf32>, vector<6x128xf32>, vector<46x128xf32> -> vector<46x128xf32>
    %5 = vector.extract_strided_slice %1 {offsets = [2, 0], sizes = [46, 6], strides = [1, 1]} : vector<48x6xf32> to vector<46x6xf32>
    %c8 = arith.constant 8 : index
    %c0_4 = arith.constant 0 : index
    %6 = vector.load %arg2[%c8, %c0_4] : memref<1680x128xf32, #tpu.memory_space<vmem>>, vector<6x128xf32>
    %cst_5 = arith.constant dense<0.000000e+00> : vector<46x128xf32>
    %7 = tpu.matmul %5, %6, %cst_5 {dimension_numbers = #tpu.dot_dimension_numbers<[1], [0], [0], [1], [0, 0, 1, 1], [], []>} : vector<46x6xf32>, vector<6x128xf32>, vector<46x128xf32> -> vector<46x128xf32>
    %8 = arith.addf %4, %7 : vector<46x128xf32>
    %c0_6 = arith.constant 0 : index
    %c0_7 = arith.constant 0 : index
    %9 = vector.load %arg3[%c0_6, %c0_7] : memref<10x128xf32, #tpu.memory_space<vmem>>, vector<1x128xf32>
    %10 = vector.broadcast %9 : vector<1x128xf32> to vector<46x128xf32>
    %11 = arith.mulf %8, %10 : vector<46x128xf32>
    %c1 = arith.constant 1 : index
    %c0_8 = arith.constant 0 : index
    %12 = vector.load %arg3[%c1, %c0_8] : memref<10x128xf32, #tpu.memory_space<vmem>>, vector<1x128xf32>
    %13 = vector.broadcast %12 : vector<1x128xf32> to vector<46x128xf32>
    %14 = arith.addf %11, %13 : vector<46x128xf32>
    %cst_9 = arith.constant 0.000000e+00 : f32
    %15 = vector.broadcast %cst_9 : f32 to vector<46x128xf32>
    %16 = arith.cmpf ogt, %14, %15 : vector<46x128xf32>
    %cst_10 = arith.constant 2.000000e-01 : f32
    %17 = vector.broadcast %cst_10 : f32 to vector<46x128xf32>
    %18 = arith.mulf %17, %14 : vector<46x128xf32>
    %19 = arith.select %16, %14, %18 : vector<46x128xi1>, vector<46x128xf32>
    %20 = vector.extract_strided_slice %19 {offsets = [0, 0], sizes = [42, 128], strides = [1, 1]} : vector<46x128xf32> to vector<42x128xf32>
    %c16 = arith.constant 16 : index
    %c0_11 = arith.constant 0 : index
    %21 = vector.load %arg2[%c16, %c0_11] : memref<1680x128xf32, #tpu.memory_space<vmem>>, vector<128x128xf32>
    %cst_12 = arith.constant dense<0.000000e+00> : vector<42x128xf32>
    %22 = tpu.matmul %20, %21, %cst_12 {dimension_numbers = #tpu.dot_dimension_numbers<[1], [0], [0], [1], [0, 0, 1, 1], [], []>} : vector<42x128xf32>, vector<128x128xf32>, vector<42x128xf32> -> vector<42x128xf32>
    %23 = vector.extract_strided_slice %19 {offsets = [4, 0], sizes = [42, 128], strides = [1, 1]} : vector<46x128xf32> to vector<42x128xf32>
    %c144 = arith.constant 144 : index
    %c0_13 = arith.constant 0 : index
    %24 = vector.load %arg2[%c144, %c0_13] : memref<1680x128xf32, #tpu.memory_space<vmem>>, vector<128x128xf32>
    %cst_14 = arith.constant dense<0.000000e+00> : vector<42x128xf32>
    %25 = tpu.matmul %23, %24, %cst_14 {dimension_numbers = #tpu.dot_dimension_numbers<[1], [0], [0], [1], [0, 0, 1, 1], [], []>} : vector<42x128xf32>, vector<128x128xf32>, vector<42x128xf32> -> vector<42x128xf32>
    %26 = arith.addf %22, %25 : vector<42x128xf32>
    %c2 = arith.constant 2 : index
    %c0_15 = arith.constant 0 : index
    %27 = vector.load %arg3[%c2, %c0_15] : memref<10x128xf32, #tpu.memory_space<vmem>>, vector<1x128xf32>
    %28 = vector.broadcast %27 : vector<1x128xf32> to vector<42x128xf32>
    %29 = arith.mulf %26, %28 : vector<42x128xf32>
    %c3 = arith.constant 3 : index
    %c0_16 = arith.constant 0 : index
    %30 = vector.load %arg3[%c3, %c0_16] : memref<10x128xf32, #tpu.memory_space<vmem>>, vector<1x128xf32>
    %31 = vector.broadcast %30 : vector<1x128xf32> to vector<42x128xf32>
    %32 = arith.addf %29, %31 : vector<42x128xf32>
    %cst_17 = arith.constant 0.000000e+00 : f32
    %33 = vector.broadcast %cst_17 : f32 to vector<42x128xf32>
    %34 = arith.cmpf ogt, %32, %33 : vector<42x128xf32>
    %cst_18 = arith.constant 2.000000e-01 : f32
    %35 = vector.broadcast %cst_18 : f32 to vector<42x128xf32>
    %36 = arith.mulf %35, %32 : vector<42x128xf32>
    %37 = arith.select %34, %32, %36 : vector<42x128xi1>, vector<42x128xf32>
    %38 = vector.extract_strided_slice %37 {offsets = [0, 0], sizes = [34, 128], strides = [1, 1]} : vector<42x128xf32> to vector<34x128xf32>
    %c272 = arith.constant 272 : index
    %c0_19 = arith.constant 0 : index
    %39 = vector.load %arg2[%c272, %c0_19] : memref<1680x128xf32, #tpu.memory_space<vmem>>, vector<128x128xf32>
    %cst_20 = arith.constant dense<0.000000e+00> : vector<34x128xf32>
    %40 = tpu.matmul %38, %39, %cst_20 {dimension_numbers = #tpu.dot_dimension_numbers<[1], [0], [0], [1], [0, 0, 1, 1], [], []>} : vector<34x128xf32>, vector<128x128xf32>, vector<34x128xf32> -> vector<34x128xf32>
    %41 = vector.extract_strided_slice %37 {offsets = [8, 0], sizes = [34, 128], strides = [1, 1]} : vector<42x128xf32> to vector<34x128xf32>
    %c400 = arith.constant 400 : index
    %c0_21 = arith.constant 0 : index
    %42 = vector.load %arg2[%c400, %c0_21] : memref<1680x128xf32, #tpu.memory_space<vmem>>, vector<128x128xf32>
    %cst_22 = arith.constant dense<0.000000e+00> : vector<34x128xf32>
    %43 = tpu.matmul %41, %42, %cst_22 {dimension_numbers = #tpu.dot_dimension_numbers<[1], [0], [0], [1], [0, 0, 1, 1], [], []>} : vector<34x128xf32>, vector<128x128xf32>, vector<34x128xf32> -> vector<34x128xf32>
    %44 = arith.addf %40, %43 : vector<34x128xf32>
    %c4 = arith.constant 4 : index
    %c0_23 = arith.constant 0 : index
    %45 = vector.load %arg3[%c4, %c0_23] : memref<10x128xf32, #tpu.memory_space<vmem>>, vector<1x128xf32>
    %46 = vector.broadcast %45 : vector<1x128xf32> to vector<34x128xf32>
    %47 = arith.mulf %44, %46 : vector<34x128xf32>
    %c5 = arith.constant 5 : index
    %c0_24 = arith.constant 0 : index
    %48 = vector.load %arg3[%c5, %c0_24] : memref<10x128xf32, #tpu.memory_space<vmem>>, vector<1x128xf32>
    %49 = vector.broadcast %48 : vector<1x128xf32> to vector<34x128xf32>
    %50 = arith.addf %47, %49 : vector<34x128xf32>
    %cst_25 = arith.constant 0.000000e+00 : f32
    %51 = vector.broadcast %cst_25 : f32 to vector<34x128xf32>
    %52 = arith.cmpf ogt, %50, %51 : vector<34x128xf32>
    %cst_26 = arith.constant 2.000000e-01 : f32
    %53 = vector.broadcast %cst_26 : f32 to vector<34x128xf32>
    %54 = arith.mulf %53, %50 : vector<34x128xf32>
    %55 = arith.select %52, %50, %54 : vector<34x128xi1>, vector<34x128xf32>
    %56 = vector.extract_strided_slice %55 {offsets = [0, 0], sizes = [29, 128], strides = [1, 1]} : vector<34x128xf32> to vector<29x128xf32>
    %c528 = arith.constant 528 : index
    %c0_27 = arith.constant 0 : index
    %57 = vector.load %arg2[%c528, %c0_27] : memref<1680x128xf32, #tpu.memory_space<vmem>>, vector<128x128xf32>
    %cst_28 = arith.constant dense<0.000000e+00> : vector<29x128xf32>
    %58 = tpu.matmul %56, %57, %cst_28 {dimension_numbers = #tpu.dot_dimension_numbers<[1], [0], [0], [1], [0, 0, 1, 1], [], []>} : vector<29x128xf32>, vector<128x128xf32>, vector<29x128xf32> -> vector<29x128xf32>
    %59 = vector.extract_strided_slice %55 {offsets = [1, 0], sizes = [29, 128], strides = [1, 1]} : vector<34x128xf32> to vector<29x128xf32>
    %c656 = arith.constant 656 : index
    %c0_29 = arith.constant 0 : index
    %60 = vector.load %arg2[%c656, %c0_29] : memref<1680x128xf32, #tpu.memory_space<vmem>>, vector<128x128xf32>
    %cst_30 = arith.constant dense<0.000000e+00> : vector<29x128xf32>
    %61 = tpu.matmul %59, %60, %cst_30 {dimension_numbers = #tpu.dot_dimension_numbers<[1], [0], [0], [1], [0, 0, 1, 1], [], []>} : vector<29x128xf32>, vector<128x128xf32>, vector<29x128xf32> -> vector<29x128xf32>
    %62 = arith.addf %58, %61 : vector<29x128xf32>
    %63 = vector.extract_strided_slice %55 {offsets = [2, 0], sizes = [29, 128], strides = [1, 1]} : vector<34x128xf32> to vector<29x128xf32>
    %c784 = arith.constant 784 : index
    %c0_31 = arith.constant 0 : index
    %64 = vector.load %arg2[%c784, %c0_31] : memref<1680x128xf32, #tpu.memory_space<vmem>>, vector<128x128xf32>
    %cst_32 = arith.constant dense<0.000000e+00> : vector<29x128xf32>
    %65 = tpu.matmul %63, %64, %cst_32 {dimension_numbers = #tpu.dot_dimension_numbers<[1], [0], [0], [1], [0, 0, 1, 1], [], []>} : vector<29x128xf32>, vector<128x128xf32>, vector<29x128xf32> -> vector<29x128xf32>
    %66 = arith.addf %62, %65 : vector<29x128xf32>
    %67 = vector.extract_strided_slice %55 {offsets = [3, 0], sizes = [29, 128], strides = [1, 1]} : vector<34x128xf32> to vector<29x128xf32>
    %c912 = arith.constant 912 : index
    %c0_33 = arith.constant 0 : index
    %68 = vector.load %arg2[%c912, %c0_33] : memref<1680x128xf32, #tpu.memory_space<vmem>>, vector<128x128xf32>
    %cst_34 = arith.constant dense<0.000000e+00> : vector<29x128xf32>
    %69 = tpu.matmul %67, %68, %cst_34 {dimension_numbers = #tpu.dot_dimension_numbers<[1], [0], [0], [1], [0, 0, 1, 1], [], []>} : vector<29x128xf32>, vector<128x128xf32>, vector<29x128xf32> -> vector<29x128xf32>
    %70 = arith.addf %66, %69 : vector<29x128xf32>
    %71 = vector.extract_strided_slice %55 {offsets = [4, 0], sizes = [29, 128], strides = [1, 1]} : vector<34x128xf32> to vector<29x128xf32>
    %c1040 = arith.constant 1040 : index
    %c0_35 = arith.constant 0 : index
    %72 = vector.load %arg2[%c1040, %c0_35] : memref<1680x128xf32, #tpu.memory_space<vmem>>, vector<128x128xf32>
    %cst_36 = arith.constant dense<0.000000e+00> : vector<29x128xf32>
    %73 = tpu.matmul %71, %72, %cst_36 {dimension_numbers = #tpu.dot_dimension_numbers<[1], [0], [0], [1], [0, 0, 1, 1], [], []>} : vector<29x128xf32>, vector<128x128xf32>, vector<29x128xf32> -> vector<29x128xf32>
    %74 = arith.addf %70, %73 : vector<29x128xf32>
    %75 = vector.extract_strided_slice %55 {offsets = [5, 0], sizes = [29, 128], strides = [1, 1]} : vector<34x128xf32> to vector<29x128xf32>
    %c1168 = arith.constant 1168 : index
    %c0_37 = arith.constant 0 : index
    %76 = vector.load %arg2[%c1168, %c0_37] : memref<1680x128xf32, #tpu.memory_space<vmem>>, vector<128x128xf32>
    %cst_38 = arith.constant dense<0.000000e+00> : vector<29x128xf32>
    %77 = tpu.matmul %75, %76, %cst_38 {dimension_numbers = #tpu.dot_dimension_numbers<[1], [0], [0], [1], [0, 0, 1, 1], [], []>} : vector<29x128xf32>, vector<128x128xf32>, vector<29x128xf32> -> vector<29x128xf32>
    %78 = arith.addf %74, %77 : vector<29x128xf32>
    %c0_39 = arith.constant 0 : index
    %c0_40 = arith.constant 0 : index
    %79 = vector.load %arg4[%c0_39, %c0_40] : memref<2x29xf32, #tpu.memory_space<vmem>>, vector<2x29xf32>
    %cst_41 = arith.constant dense<0.000000e+00> : vector<2x128xf32>
    %80 = tpu.matmul %79, %78, %cst_41 {dimension_numbers = #tpu.dot_dimension_numbers<[1], [0], [0], [1], [0, 0, 1, 1], [], []>} : vector<2x29xf32>, vector<29x128xf32>, vector<2x128xf32> -> vector<2x128xf32>
    %c6 = arith.constant 6 : index
    %c0_42 = arith.constant 0 : index
    %81 = vector.load %arg3[%c6, %c0_42] : memref<10x128xf32, #tpu.memory_space<vmem>>, vector<1x128xf32>
    %82 = vector.broadcast %81 : vector<1x128xf32> to vector<2x128xf32>
    %83 = arith.addf %80, %82 : vector<2x128xf32>
    %cst_43 = arith.constant 0.000000e+00 : f32
    %84 = vector.broadcast %cst_43 : f32 to vector<2x128xf32>
    %85 = arith.maximumf %83, %84 : vector<2x128xf32>
    %c1296 = arith.constant 1296 : index
    %c0_44 = arith.constant 0 : index
    %86 = vector.load %arg2[%c1296, %c0_44] : memref<1680x128xf32, #tpu.memory_space<vmem>>, vector<128x128xf32>
    %cst_45 = arith.constant dense<0.000000e+00> : vector<2x128xf32>
    %87 = tpu.matmul %85, %86, %cst_45 {dimension_numbers = #tpu.dot_dimension_numbers<[1], [0], [0], [1], [0, 0, 1, 1], [], []>} : vector<2x128xf32>, vector<128x128xf32>, vector<2x128xf32> -> vector<2x128xf32>
    %c7 = arith.constant 7 : index
    %c0_46 = arith.constant 0 : index
    %88 = vector.load %arg3[%c7, %c0_46] : memref<10x128xf32, #tpu.memory_space<vmem>>, vector<1x128xf32>
    %89 = vector.broadcast %88 : vector<1x128xf32> to vector<2x128xf32>
    %90 = arith.addf %87, %89 : vector<2x128xf32>
    %cst_47 = arith.constant 0.000000e+00 : f32
    %91 = vector.broadcast %cst_47 : f32 to vector<2x128xf32>
    %92 = arith.maximumf %90, %91 : vector<2x128xf32>
    %c1424 = arith.constant 1424 : index
    %c0_48 = arith.constant 0 : index
    %93 = vector.load %arg2[%c1424, %c0_48] : memref<1680x128xf32, #tpu.memory_space<vmem>>, vector<128x128xf32>
    %cst_49 = arith.constant dense<0.000000e+00> : vector<2x128xf32>
    %94 = tpu.matmul %92, %93, %cst_49 {dimension_numbers = #tpu.dot_dimension_numbers<[1], [0], [0], [1], [0, 0, 1, 1], [], []>} : vector<2x128xf32>, vector<128x128xf32>, vector<2x128xf32> -> vector<2x128xf32>
    %c8_50 = arith.constant 8 : index
    %c0_51 = arith.constant 0 : index
    %95 = vector.load %arg3[%c8_50, %c0_51] : memref<10x128xf32, #tpu.memory_space<vmem>>, vector<1x128xf32>
    %96 = vector.broadcast %95 : vector<1x128xf32> to vector<2x128xf32>
    %97 = arith.addf %94, %96 : vector<2x128xf32>
    %cst_52 = arith.constant 0.000000e+00 : f32
    %98 = vector.broadcast %cst_52 : f32 to vector<2x128xf32>
    %99 = arith.maximumf %97, %98 : vector<2x128xf32>
    %c1552 = arith.constant 1552 : index
    %c0_53 = arith.constant 0 : index
    %100 = vector.load %arg2[%c1552, %c0_53] : memref<1680x128xf32, #tpu.memory_space<vmem>>, vector<128x128xf32>
    %cst_54 = arith.constant dense<0.000000e+00> : vector<2x128xf32>
    %101 = tpu.matmul %99, %100, %cst_54 {dimension_numbers = #tpu.dot_dimension_numbers<[1], [0], [0], [1], [0, 0, 1, 1], [], []>} : vector<2x128xf32>, vector<128x128xf32>, vector<2x128xf32> -> vector<2x128xf32>
    %c9 = arith.constant 9 : index
    %c0_55 = arith.constant 0 : index
    %102 = vector.load %arg3[%c9, %c0_55] : memref<10x128xf32, #tpu.memory_space<vmem>>, vector<1x128xf32>
    %103 = vector.broadcast %102 : vector<1x128xf32> to vector<2x128xf32>
    %104 = arith.addf %101, %103 : vector<2x128xf32>
    %105 = arith.negf %104 : vector<2x128xf32>
    %106 = math.exp %105 : vector<2x128xf32>
    %cst_56 = arith.constant 1.000000e+00 : f32
    %107 = vector.broadcast %cst_56 : f32 to vector<2x128xf32>
    %108 = arith.addf %107, %106 : vector<2x128xf32>
    %109 = arith.divf %107, %108 : vector<2x128xf32>
    %c0_57 = arith.constant 0 : index
    %c0_58 = arith.constant 0 : index
    %c0_59 = arith.constant 0 : index
    %110 = vector.load %arg5[%c0_57, %c0_58, %c0_59] : memref<1x2x128xf32, #tpu.memory_space<vmem>>, vector<1x2x128xf32>
    %111 = vector.shape_cast %110 : vector<1x2x128xf32> to vector<2x128xf32>
    %112 = vector.shape_cast %109 : vector<2x128xf32> to vector<1x2x128xf32>
    tpu.vector_store %arg5[%c0_57, %c0_58, %c0_59], %112 {strides = array<i32>} : memref<1x2x128xf32, #tpu.memory_space<vmem>>, vector<1x2x128xf32>,
    return
  }
  func.func @transform_0(%arg0: i32) -> (i32, i32, i32) {
    %c0_i32 = arith.constant 0 : i32
    %c0_i32_0 = arith.constant 0 : i32
    %c0_i32_1 = arith.constant 0 : i32
    return %arg0, %c0_i32, %c0_i32_0 : i32, i32, i32
  }
  func.func @transform_1(%arg0: i32) -> (i32, i32) {
    %c0_i32 = arith.constant 0 : i32
    %c0_i32_0 = arith.constant 0 : i32
    %c0_i32_1 = arith.constant 0 : i32
    return %c0_i32, %c0_i32_0 : i32, i32
  }
  func.func @transform_2(%arg0: i32) -> (i32, i32) {
    %c0_i32 = arith.constant 0 : i32
    %c0_i32_0 = arith.constant 0 : i32
    %c0_i32_1 = arith.constant 0 : i32
    return %c0_i32, %c0_i32_0 : i32, i32
  }
  func.func @transform_3(%arg0: i32) -> (i32, i32) {
    %c0_i32 = arith.constant 0 : i32
    %c0_i32_0 = arith.constant 0 : i32
    %c0_i32_1 = arith.constant 0 : i32
    return %c0_i32, %c0_i32_0 : i32, i32
  }
  func.func @transform_4(%arg0: i32) -> (i32, i32, i32) {
    %c0_i32 = arith.constant 0 : i32
    %c0_i32_0 = arith.constant 0 : i32
    %c0_i32_1 = arith.constant 0 : i32
    return %arg0, %c0_i32, %c0_i32_0 : i32, i32, i32
  }
}

</mosaic_0001>

<bundles_post_ra>
// kernel: tpu_custom_call.1
= control target key start
LH: loop header
LB: loop body
LE: loop exit
PB: predicated region body
PF: predicated region fallthrough
CT: control target
= control target key end

     0   :  { %9 = vsyncpa [#allocation3], 0  ;;  %s3602_s0 = inlined_call_operand.vmem [shape: f32[1,48,6], index: 0, kind: input, shape index: {}]   ;;  %s3603_s1 = inlined_call_operand.hbm [shape: f32[1680,128], index: 1, kind: input, shape index: {}]   ;;  %s3604_s2 = inlined_call_operand.vmem [shape: f32[10,128], index: 2, kind: input, shape index: {}]   ;;  %s3605_s3 = inlined_call_operand.vmem [shape: f32[2,29], index: 3, kind: input, shape index: {}]   ;;  %s3606_s4 = inlined_call_operand.hbm [shape: f32[1,2,128], index: 4, kind: output, shape index: {}]  }
   0x1   :  { %10 = vsyncpa [#allocation4], 0  ;;  %s3252_s15 = smov [#allocation2]   ;;  %s3204_s19 = scalar_lea.hbm %s3603_s1, 26880 }
   0x2   :  { %s18_s16 = sshll.u32 %s3252_s15, 4  ;;  %p3205_p0 = scmp.ne.s32.totalorder %s3603_s1, %s3204_s19  ;;  %s19_s16 = int_to_ptr.vmem [resolvable:$true] %s18_s16 }
   0x3   :  { %p3208_p1 = scmp.lt.u32.totalorder %s3204_s19, %s3603_s1 }
   0x5   :  { %p3210_p2 = pnand %p3208_p1, %p3205_p0 }
   0x7   :  { %3213 = shalt.err (!%p3210_p2)
}
   0x8   :  { %s3214_s24 = scalar_lea.vmem %s19_s16, 26880  ;;  %p3219_p4 = scmp.lt.s32.totalorder %s19_s16, %s19_s16 }
   0x9   :  { %p3215_p3 = scmp.ne.s32.totalorder %s19_s16, %s3214_s24  ;;  %p3220_p5 = scmp.lt.s32.totalorder %s3214_s24, %s3214_s24 }
   0xb   :  { %p3221_p6 = por %p3220_p5, %p3219_p4 }
   0xd   :  { %p3222_p7 = pnand %p3221_p6, %p3215_p3 }
   0xf   :  { %3225 = shalt.err (!%p3222_p7)
}
  0x10   :  { %s3253_s25 = smov 128   ;;  %s3254_s26 = smov 8  }
  0x11   :  { %24 = dma.hbm_to_vmem [thread:$0]  %s3603_s1, 26880, %s19_s16, [#allocation3], %s3253_s25, %s3253_s25, %s3254_s26  }
  0x12   :  { %3248 = dma.done.wait [#allocation3], 26880  }
  0x13   :  { %3249 = vsyncadd [#allocation3], 4294940416  ;;  %vm46_vm0 = vcmask 1045504   ;;  %v39_v0 = vld [vmem:[#allocation2 + $0x8] sm:$0x3f]  ;;  %v32_v1 = vld [vmem:[%s3602_s0] sm:$0xff] }
  0x14   :  { %v33_v2 = vld [vmem:[%s3602_s0 + $0x8] sm:$0xff]  ;;  %2225 = vmatprep.subr.msk.mxu0 %vm46_vm0, %v39_v0  ;;  %v47_v3 = vrot.slane %v32_v1, 2  ;;  %vm58_vm1 = vcmask 48128   ;;  %v34_v5 = vld [vmem:[%s3602_s0 + $0x10] sm:$0xff]  ;;  %v3310_v6 = vld [vmem:[%s3602_s0 + $0x18] sm:$0xff]  ;;  %vm357_vm4 = vcmask 1043456  }
  0x15   :  { %v48_v4 = vrot.slane %v33_v2, 2  ;;  %v3315_v7 = vld [vmem:[%s3602_s0 + $0x20] sm:$0xff]  ;;  %2226 = vmatpush3.msk.msra.mxu0 %vm46_vm0, %v39_v0  ;;  %v50_v8 = vrot.slane %v34_v5, 2  ;;  %v52_v9 = vrot.slane %v3310_v6, 2  ;;  %v3323_v11 = vld [vmem:[%s3602_s0 + $0x28] sm:$0xff]  ;;  %v319_v15 = vld [vmem:[#allocation2 + $0x10] sm:$0xff] }
  0x16   :  { %v54_v10 = vrot.slane %v3315_v7, 2  ;;  %v38_v12 = vld [vmem:[#allocation2] sm:$0x3f]  ;;  %v56_v14 = vrot.slane %v3323_v11, 2  ;;  %v320_v16 = vld [vmem:[#allocation2 + $0x18] sm:$0xff]  ;;  %v322_v21 = vld [vmem:[#allocation2 + $0x28] sm:$0xff] }
  0x17   :  { %v49_v13 = vsel %vm46_vm0, %v47_v3, %v48_v4  ;;  %2236 = vmatprep.subr.msk.mxu0 %vm46_vm0, %v38_v12  ;;  %v321_v17 = vld [vmem:[#allocation2 + $0x20] sm:$0xff]  ;;  %v51_v18 = vsel %vm46_vm0, %v48_v4, %v50_v8  ;;  %v53_v19 = vsel %vm46_vm0, %v50_v8, %v52_v9  ;;  %v2799_v20 = vpack.c.bf16 %v320_v16, %v319_v15  ;;  %v335_v22 = vld [vmem:[#allocation2 + $0x90] sm:$0xff]  ;;  %v336_v23 = vld [vmem:[#allocation2 + $0x98] sm:$0xff]  ;;  %s3259_s8 = smov [#allocation5]  }
  0x18   :  { %2227 = vmatprep.mubr.msk.f32.mxu0 %vm58_vm1, %v49_v13  ;;  %v2803_v24 = vpack.c.bf16 %v322_v21, %v321_v17  ;;  %v2767_v25 = vpack.c.bf16 %v336_v23, %v335_v22  ;;  %v55_v26 = vsel %vm46_vm0, %v52_v9, %v54_v10  ;;  %v323_v27 = vld [vmem:[#allocation2 + $0x30] sm:$0xff]  ;;  %v324_v28 = vld [vmem:[#allocation2 + $0x38] sm:$0xff]  ;;  %v57_v29 = vsel %vm46_vm0, %v54_v10, %v56_v14  ;;  %v325_v31 = vld [vmem:[#allocation2 + $0x40] sm:$0xff]  ;;  %s1913_s1 = sshll.u32 %s3259_s8, 4  ;;  %s1914_s1 = int_to_ptr.vmem [resolvable:$true] %s1913_s1 }
  0x19   :  { %2228 = vmatmul.mubr.msk.f32.vlgmr.msra.gmra.mrb[0].mxu0 %vm58_vm1, %v51_v18  ;;  %2800 = vmatprep.subr.bf16.mxu1 %v2799_v20  ;;  %v2807_v30 = vpack.c.bf16 %v324_v28, %v323_v27  ;;  %v326_v32 = vld [vmem:[#allocation2 + $0x48] sm:$0xff]  ;;  %v337_v33 = vld [vmem:[#allocation2 + $0xa0] sm:$0xff]  ;;  %v327_v36 = vld [vmem:[#allocation2 + $0x50] sm:$0xff]  ;;  %v3255_v3 = vmov 0.0|0.0   ;;  %vm3256_vm9 = vmmov 0   ;;  %s3226_s9 = scalar_lea.vmem %s1914_s1, 32  ;;  %p3231_p9 = scmp.lt.s32.totalorder %s1914_s1, %s1914_s1 }
  0x1a   :  { %2230 = vmatprep.mubr.msk.f32.mxu0 %vm58_vm1, %v53_v19  ;;  %2237 = vmatpush3.msk.msra.mxu0 %vm46_vm0, %v38_v12  ;;  %v338_v34 = vld [vmem:[#allocation2 + $0xa8] sm:$0xff]  ;;  %v2811_v35 = vpack.c.bf16 %v326_v32, %v325_v31  ;;  %v328_v37 = vld [vmem:[#allocation2 + $0x58] sm:$0xff]  ;;  %v339_v39 = vld [vmem:[#allocation2 + $0xb0] sm:$0xff]  ;;  %p3227_p8 = scmp.ne.s32.totalorder %s1914_s1, %s3226_s9  ;;  %p3232_p10 = scmp.lt.s32.totalorder %s3226_s9, %s3226_s9 }
  0x1b   :  { %2768 = vmatprep.subr.bf16.mxu0 %v2767_v25  ;;  %2802 = vmatpush3.bf16.msra.mxu1 %v2799_v20  ;;  %v2771_v38 = vpack.c.bf16 %v338_v34, %v337_v33  ;;  %v340_v40 = vld [vmem:[#allocation2 + $0xb8] sm:$0xff]  ;;  %v2815_v41 = vpack.c.bf16 %v328_v37, %v327_v36  ;;  %v329_v42 = vld [vmem:[#allocation2 + $0x60] sm:$0xff]  ;;  %v330_v43 = vld [vmem:[#allocation2 + $0x68] sm:$0xff] }
  0x1c   :  { %2804 = vmatprep.subr.bf16.mxu1 %v2803_v24  ;;  %v2775_v44 = vpack.c.bf16 %v340_v40, %v339_v39  ;;  %v341_v45 = vld [vmem:[#allocation2 + $0xc0] sm:$0xff]  ;;  %v342_v46 = vld [vmem:[#allocation2 + $0xc8] sm:$0xff]  ;;  %v2819_v47 = vpack.c.bf16 %v330_v43, %v329_v42  ;;  %v343_v49 = vld [vmem:[#allocation2 + $0xd0] sm:$0xff]  ;;  %p3233_p11 = por %p3232_p10, %p3231_p9 }
  0x1d   :  { %2231 = vmatmul.mubr.msk.f32.gmra.mrb[2].mxu0 %vm58_vm1, %v55_v26  ;;  %v2779_v48 = vpack.c.bf16 %v342_v46, %v341_v45  ;;  %v344_v50 = vld [vmem:[#allocation2 + $0xd8] sm:$0xff]  ;;  %v331_v52 = vld [vmem:[#allocation2 + $0x70] sm:$0xff]  ;;  %v345_v55 = vld [vmem:[#allocation2 + $0xe0] sm:$0xff] }
  0x1e   :  { %2233 = vmatprep.mubr.msk.f32.mxu0 %vm58_vm1, %v57_v29  ;;  %v2783_v51 = vpack.c.bf16 %v344_v50, %v343_v49  ;;  %v332_v53 = vld [vmem:[#allocation2 + $0x78] sm:$0xff]  ;;  %v346_v56 = vld [vmem:[#allocation2 + $0xe8] sm:$0xff]  ;;  %v333_v58 = vld [vmem:[#allocation2 + $0x80] sm:$0xff]  ;;  %p3234_p12 = pnand %p3233_p11, %p3227_p8 }
  0x1f   :  { %2806 = vmatpush3.bf16.msra.mxu1 %v2803_v24  ;;  %v2823_v54 = vpack.c.bf16 %v332_v53, %v331_v52  ;;  %v2787_v57 = vpack.c.bf16 %v346_v56, %v345_v55  ;;  %v334_v59 = vld [vmem:[#allocation2 + $0x88] sm:$0xff]  ;;  %v347_v61 = vld [vmem:[#allocation2 + $0xf0] sm:$0xff]  ;;  %v348_v62 = vld [vmem:[#allocation2 + $0xf8] sm:$0xff] }
  0x20   :  { %2808 = vmatprep.subr.bf16.mxu1 %v2807_v30  ;;  %v2827_v60 = vpack.c.bf16 %v334_v59, %v333_v58  ;;  %v2791_v63 = vpack.c.bf16 %v348_v62, %v347_v61  ;;  %v349_v0 = vld [vmem:[#allocation2 + $0x100] sm:$0xff]  ;;  %v621_v33 = vld [vmem:[#allocation2 + $0x190] sm:$0xff]  ;;  %v622_v34 = vld [vmem:[#allocation2 + $0x198] sm:$0xff] }
  0x21   :  { %2234 = vmatmul.mubr.msk.f32.gmra.mrb[4].mxu0 %vm58_vm1, %v56_v14  ;;  %v1936_v4 = vld [vmem:[%s3604_s2] ss:$0 sm:$0xff]  ;;  %v624_v46 = vld [vmem:[#allocation2 + $0x1a8] sm:$0xff]  ;;  %v625_v53 = vld [vmem:[#allocation2 + $0x1b0] sm:$0xff] }
  0x22   :  { %2238 = vmatprep.mubr.msk.f32.mxu0 %vm58_vm1, %v32_v1  ;;  %v350_v1 = vld [vmem:[#allocation2 + $0x108] sm:$0xff]  ;;  %v623_v45 = vld [vmem:[#allocation2 + $0x1a0] sm:$0xff]  ;;  %v629_v59 = vld [vmem:[#allocation2 + $0x1d0] sm:$0xff] }
  0x23   :  { %2810 = vmatpush3.bf16.msra.mxu1 %v2807_v30  ;;  %v2835_v50 = vpack.c.bf16 %v624_v46, %v623_v45  ;;  %v627_v56 = vld [vmem:[#allocation2 + $0x1c0] sm:$0xff] }
  0x24   :  { %2812 = vmatprep.subr.bf16.mxu1 %v2811_v35  ;;  %v631_v62 = vld [vmem:[#allocation2 + $0x1e0] sm:$0xff] }
  0x25   :  { %2239 = vmatmul.mubr.msk.f32.vlgmr.msra.gmra.mrb[0].mxu0 %vm58_vm1, %v33_v2  ;;  %v2795_v2 = vpack.c.bf16 %v350_v1, %v349_v0  ;;  %v633_v1 = vld [vmem:[#allocation2 + $0x1f0] sm:$0xff]  ;;  %v607_v46 = vld [vmem:[#allocation2 + $0x120] sm:$0xff] }
  0x26   :  { %2241 = vmatprep.mubr.msk.f32.mxu0 %vm58_vm1, %v34_v5  ;;  %2770 = vmatpush3.bf16.msra.mxu0 %v2767_v25 }
  0x27   :  { %2772 = vmatprep.subr.bf16.mxu0 %v2771_v38  ;;  %2814 = vmatpush3.bf16.msra.mxu1 %v2811_v35 }
  0x28   :  { %2816 = vmatprep.subr.bf16.mxu1 %v2815_v41 }
  0x29   :  { %2242 = vmatmul.mubr.msk.f32.gmra.mrb[2].mxu0 %vm58_vm1, %v3310_v6  ;;  %v1937_v6 = vld [vmem:[%s3604_s2 + $0x1] ss:$0 sm:$0xff] }
  0x2a   :  { %2244 = vmatprep.mubr.msk.f32.mxu0 %vm58_vm1, %v3315_v7  ;;  %2774 = vmatpush3.bf16.msra.mxu0 %v2771_v38 }
  0x2b   :  { %2776 = vmatprep.subr.bf16.mxu0 %v2775_v44  ;;  %2818 = vmatpush3.bf16.msra.mxu1 %v2815_v41  ;;  %v2832_v41 = vpack.c.bf16 %v622_v34, %v621_v33 }
  0x2c   :  { %2820 = vmatprep.subr.bf16.mxu1 %v2819_v47 }
  0x2d   :  { %2245 = vmatmul.mubr.msk.f32.gmra.mrb[4].mxu0 %vm58_vm1, %v3323_v11 }
  0x2e   :  { %2778 = vmatpush3.bf16.msra.mxu0 %v2775_v44 }
  0x2f   :  { %2780 = vmatprep.subr.bf16.mxu0 %v2779_v48  ;;  %2822 = vmatpush3.bf16.msra.mxu1 %v2819_v47 }
  0x30   :  { %2824 = vmatprep.subr.bf16.mxu1 %v2823_v54 }
  0x32   :  { %2782 = vmatpush3.bf16.msra.mxu0 %v2779_v48 }
  0x33   :  { %2784 = vmatprep.subr.bf16.mxu0 %v2783_v51  ;;  %2826 = vmatpush3.bf16.msra.mxu1 %v2823_v54  ;;  %v626_v54 = vld [vmem:[#allocation2 + $0x1b8] sm:$0xff] }
  0x34   :  { %2828 = vmatprep.subr.bf16.mxu1 %v2827_v60  ;;  %v2838_v55 = vpack.c.bf16 %v626_v54, %v625_v53 }
  0x36   :  { %2786 = vmatpush3.bf16.msra.mxu0 %v2783_v51 }
  0x37   :  { %2788 = vmatprep.subr.bf16.mxu0 %v2787_v57  ;;  %2830 = vmatpush3.bf16.msra.mxu1 %v2827_v60  ;;  %v630_v60 = vld [vmem:[#allocation2 + $0x1d8] sm:$0xff] }
  0x38   :  { %v2844_v61 = vpack.c.bf16 %v630_v60, %v629_v59 }
  0x3a   :  { %2790 = vmatpush3.bf16.msra.mxu0 %v2787_v57  ;;  %v628_v57 = vld [vmem:[#allocation2 + $0x1c8] sm:$0xff] }
  0x3b   :  { %2792 = vmatprep.subr.bf16.mxu0 %v2791_v63  ;;  %v2841_v58 = vpack.c.bf16 %v628_v57, %v627_v56  ;;  %v609_v57 = vld [vmem:[#allocation2 + $0x130] sm:$0xff] }
  0x3e   :  { %2794 = vmatpush3.bf16.msra.mxu0 %v2791_v63  ;;  %v632_v63 = vld [vmem:[#allocation2 + $0x1e8] sm:$0xff] }
  0x3f   :  { %2796 = vmatprep.subr.bf16.mxu0 %v2795_v2  ;;  %v2847_v0 = vpack.c.bf16 %v632_v63, %v631_v62 }
  0x42   :  { %2798 = vmatpush3.bf16.msra.mxu0 %v2795_v2  ;;  %v634_v2 = vld [vmem:[#allocation2 + $0x1f8] sm:$0xff] }
  0x43   :  { %2831 = vmatprep.subr.bf16.mxu0 %v3255_v3 }
  0xf8   :  { %v2240_v5 = vpop.f32.mrb[0].mxu0 }
  0xf9   :  { %v285_v7 = vmul.f32 %v2240_v5, %v1936_v4  ;;  %v250_v8 = vpop.f32.mrb[1].mxu0  ;;  %v635_v5 = vld [vmem:[#allocation2 + $0x200] sm:$0xff] }
  0xfa   :  { %v284_v9 = vmul.f32 %v1936_v4, %v250_v8  ;;  %v3257_v8 = vmov 0.0  }
  0xfb   :  { %v296_v10 = vadd.f32 %v1937_v6, %v285_v7 }
  0xfc   :  { %v295_v11 = vadd.f32 %v1937_v6, %v284_v9  ;;  %v2243_v12 = vpop.f32.mrb[2].mxu0  ;;  %v868_v9 = vld [vmem:[#allocation2 + $0x290] sm:$0xff] }
  0xfd   :  { %v287_v13 = vmul.f32 %v2243_v12, %v1936_v4  ;;  %v260_v14 = vpop.f32.mrb[3].mxu0  ;;  %vm302_vm2 = vcmp.gt.f32.partialorder %v296_v10, 0.0  ;;  %v308_v15 = vmul.f32 0.2, %v296_v10 }
  0xfe   :  { %v286_v16 = vmul.f32 %v1936_v4, %v260_v14  ;;  %vm301_vm3 = vcmp.gt.f32.partialorder %v295_v11, 0.0  ;;  %v307_v17 = vmul.f32 0.2, %v295_v11 }
  0xff   :  { %v298_v18 = vadd.f32 %v1937_v6, %v287_v13  ;;  %v314_v19 = vsel %vm302_vm2, %v296_v10, %v308_v15  ;;  %v869_v10 = vld [vmem:[#allocation2 + $0x298] sm:$0xff]  ;;  %v871_v13 = vld [vmem:[#allocation2 + $0x2a8] sm:$0xff]  ;;  %v872_v15 = vld [vmem:[#allocation2 + $0x2b0] sm:$0xff]  ;;  %vm888_vm2 = vcmask 1046528  }
 0x100   :  { %v297_v20 = vadd.f32 %v1937_v6, %v286_v16  ;;  %v2246_v21 = vpop.f32.mrb[4].mxu0  ;;  %v313_v22 = vsel %vm301_vm3, %v295_v11, %v307_v17  ;;  %v359_v23 = vrot.slane %v314_v19, 4  ;;  %v870_v11 = vld [vmem:[#allocation2 + $0x2a0] sm:$0xff]  ;;  %v2879_v12 = vpack.c.bf16 %v869_v10, %v868_v9  ;;  %v873_v16 = vld [vmem:[#allocation2 + $0x2b8] sm:$0xff] }
 0x101   :  { %v289_v24 = vmul.f32 %v2246_v21, %v1936_v4  ;;  %v270_v25 = vpop.f32.mrb[5].mxu0  ;;  %v358_v26 = vrot.slane %v313_v22, 4  ;;  %2320 = vmatprep.mubr.f32.mxu1 %v313_v22  ;;  %vm304_vm5 = vcmp.gt.f32.partialorder %v298_v18, 0.0  ;;  %v310_v27 = vmul.f32 0.2, %v298_v18  ;;  %v614_v9 = vld [vmem:[#allocation2 + $0x158] sm:$0xff] }
 0x102   :  { %v288_v28 = vmul.f32 %v1936_v4, %v270_v25  ;;  %2321 = vmatmul.mubr.f32.vlgmr.msra.gmra.mrb[0].mxu1 %v314_v19  ;;  %vm303_vm6 = vcmp.gt.f32.partialorder %v297_v20, 0.0  ;;  %v309_v29 = vmul.f32 0.2, %v297_v20  ;;  %v2850_v4 = vpack.c.bf16 %v634_v2, %v633_v1  ;;  %2880 = vmatprep.subr.bf16.mxu1 %v2879_v12  ;;  %v875_v19 = vld [vmem:[#allocation2 + $0x2c8] sm:$0xff] }
 0x103   :  { %v300_v30 = vadd.f32 %v1937_v6, %v289_v24  ;;  %v360_v31 = vsel %vm357_vm4, %v358_v26, %v359_v23  ;;  %v316_v32 = vsel %vm304_vm5, %v298_v18, %v310_v27  ;;  %v2883_v14 = vpack.c.bf16 %v871_v13, %v870_v11  ;;  %2882 = vmatpush3.bf16.msra.mxu1 %v2879_v12  ;;  %v874_v18 = vld [vmem:[#allocation2 + $0x2c0] sm:$0xff]  ;;  %v612_v1 = vld [vmem:[#allocation2 + $0x148] sm:$0xff] }
 0x104   :  { %v299_v35 = vadd.f32 %v1937_v6, %v288_v28  ;;  %2279 = vmatprep.mubr.f32.mxu0 %v360_v31  ;;  %v315_v36 = vsel %vm303_vm6, %v297_v20, %v309_v29  ;;  %v363_v37 = vrot.slane %v316_v32, 4  ;;  %v636_v6 = vld [vmem:[#allocation2 + $0x208] sm:$0xff]  ;;  %v2887_v17 = vpack.c.bf16 %v873_v16, %v872_v15  ;;  %v3373_v26 = vld [vmem:[%s3604_s2 + $0x2] ss:$0 sm:$0xff]  ;;  %v3378_v29 = vld [vmem:[%s3604_s2 + $0x3] ss:$0 sm:$0xff] }
 0x105   :  { %v361_v38 = vrot.slane %v315_v36, 4  ;;  %2323 = vmatprep.mubr.f32.mxu1 %v315_v36  ;;  %vm306_vm7 = vcmp.gt.f32.partialorder %v300_v30, 0.0  ;;  %v312_v39 = vmul.f32 0.2, %v300_v30  ;;  %v2853_v7 = vpack.c.bf16 %v636_v6, %v635_v5  ;;  %2884 = vmatprep.subr.bf16.mxu1 %v2883_v14  ;;  %v606_v36 = vld [vmem:[#allocation2 + $0x118] sm:$0xff]  ;;  %v615_v13 = vld [vmem:[#allocation2 + $0x160] sm:$0xff] }
 0x106   :  { %2324 = vmatmul.mubr.f32.gmra.mrb[2].mxu1 %v316_v32  ;;  %vm305_vm8 = vcmp.gt.f32.partialorder %v299_v35, 0.0  ;;  %v311_v40 = vmul.f32 0.2, %v299_v35  ;;  %v2891_v20 = vpack.c.bf16 %v875_v19, %v874_v18  ;;  %v618_v18 = vld [vmem:[#allocation2 + $0x178] sm:$0xff]  ;;  %vm1202_vm5 = vcmask 1044480  }
 0x107   :  { %v362_v42 = vsel %vm357_vm4, %v359_v23, %v361_v38  ;;  %v364_v43 = vsel %vm357_vm4, %v361_v38, %v363_v37  ;;  %v318_v44 = vsel %vm306_vm7, %v300_v30, %v312_v39  ;;  %2886 = vmatpush3.bf16.msra.mxu1 %v2883_v14  ;;  %v616_v14 = vld [vmem:[#allocation2 + $0x168] sm:$0xff]  ;;  %vm1438_vm6 = vcmask 1042432  }
 0x108   :  { %2280 = vmatmul.mubr.f32.vlgmr.msra.gmra.mrb[6].mxu0 %v362_v42  ;;  %v317_v47 = vsel %vm305_vm8, %v299_v35, %v311_v40  ;;  %v367_v48 = vrot.slane %v318_v44, 4  ;;  %2888 = vmatprep.subr.bf16.mxu1 %v2887_v17  ;;  %v605_v35 = vld [vmem:[#allocation2 + $0x110] sm:$0xff]  ;;  %v2871_v16 = vpack.c.bf16 %v616_v14, %v615_v13 }
 0x109   :  { %2282 = vmatprep.mubr.f32.mxu0 %v364_v43  ;;  %v365_v49 = vrot.slane %v317_v47, 4  ;;  %2326 = vmatprep.mubr.f32.mxu1 %v317_v47  ;;  %v2856_v43 = vpack.c.bf16 %v606_v36, %v605_v35  ;;  %v608_v47 = vld [vmem:[#allocation2 + $0x128] sm:$0xff]  ;;  %v882_v36 = vld [vmem:[#allocation2 + $0x300] sm:$0xff] }
 0x10a   :  { %2327 = vmatmul.mubr.f32.gmra.mrb[4].mxu1 %v318_v44  ;;  %2833 = vmatpush3.bf16.msra.mxu0 %v2832_v41  ;;  %v2859_v54 = vpack.c.bf16 %v608_v47, %v607_v46 }
 0x10b   :  { %v366_v51 = vsel %vm357_vm4, %v363_v37, %v365_v49  ;;  %v368_v52 = vsel %vm357_vm4, %v365_v49, %v367_v48  ;;  %2834 = vmatprep.subr.bf16.mxu0 %v3255_v3  ;;  %2890 = vmatpush3.bf16.msra.mxu1 %v2887_v17  ;;  %v617_v17 = vld [vmem:[#allocation2 + $0x170] sm:$0xff] }
 0x10c   :  { %2283 = vmatmul.mubr.f32.gmra.mrb[8].mxu0 %v366_v51  ;;  %2892 = vmatprep.subr.bf16.mxu1 %v2891_v20 }
 0x10d   :  { %2285 = vmatprep.mubr.f32.mxu0 %v368_v52 }
 0x10e   :  { %2836 = vmatpush3.bf16.msra.mxu0 %v2835_v50 }
 0x10f   :  { %2837 = vmatprep.subr.bf16.mxu0 %v3255_v3  ;;  %2894 = vmatpush3.bf16.msra.mxu1 %v2891_v20  ;;  %v2874_v20 = vpack.c.bf16 %v618_v18, %v617_v17 }
 0x110   :  { %2286 = vmatmul.mubr.f32.gmra.mrb[10].mxu0 %v367_v48 }
 0x111   :  { %2361 = vmatprep.mubr.msk.f32.mxu0 %vm3256_vm9, %v3257_v8 }
 0x112   :  { %2839 = vmatpush3.bf16.msra.mxu0 %v2838_v55 }
 0x113   :  { %2840 = vmatprep.subr.bf16.mxu0 %v3255_v3 }
 0x116   :  { %2842 = vmatpush3.bf16.msra.mxu0 %v2841_v58  ;;  %v610_v58 = vld [vmem:[#allocation2 + $0x138] sm:$0xff] }
 0x117   :  { %2843 = vmatprep.subr.bf16.mxu0 %v3255_v3  ;;  %v2862_v62 = vpack.c.bf16 %v610_v58, %v609_v57 }
 0x11a   :  { %2845 = vmatpush3.bf16.msra.mxu0 %v2844_v61 }
 0x11b   :  { %2846 = vmatprep.subr.bf16.mxu0 %v3255_v3 }
 0x11e   :  { %2848 = vmatpush3.bf16.msra.mxu0 %v2847_v0  ;;  %v611_v0 = vld [vmem:[#allocation2 + $0x140] sm:$0xff] }
 0x11f   :  { %2849 = vmatprep.subr.bf16.mxu0 %v3255_v3  ;;  %v2865_v5 = vpack.c.bf16 %v612_v1, %v611_v0 }
 0x122   :  { %2851 = vmatpush3.bf16.msra.mxu0 %v2850_v4 }
 0x123   :  { %2852 = vmatprep.subr.bf16.mxu0 %v3255_v3 }
 0x126   :  { %2854 = vmatpush3.bf16.msra.mxu0 %v2853_v7  ;;  %v613_v7 = vld [vmem:[#allocation2 + $0x150] sm:$0xff] }
 0x127   :  { %2855 = vmatprep.subr.bf16.mxu0 %v3255_v3  ;;  %v2868_v11 = vpack.c.bf16 %v614_v9, %v613_v7 }
 0x1d5   :  { %v2322_v21 = vpop.f32.mrb[0].mxu1 }
 0x1d6   :  { %v536_v22 = vpop.f32.mrb[1].mxu1 }
 0x1d9   :  { %v2325_v23 = vpop.f32.mrb[2].mxu1 }
 0x1da   :  { %v546_v24 = vpop.f32.mrb[3].mxu1 }
 0x1db   :  { %v2281_v25 = vpop.f32.mrb[6].mxu0 }
 0x1dc   :  { %v542_v27 = vadd.f32 %v2322_v21, %v2281_v25  ;;  %v441_v28 = vpop.f32.mrb[7].mxu0  ;;  %v619_v21 = vld [vmem:[#allocation2 + $0x180] sm:$0xff] }
 0x1dd   :  { %v3380_v30 = vadd.f32 %v536_v22, %v441_v28  ;;  %v2328_v31 = vpop.f32.mrb[4].mxu1  ;;  %v620_v22 = vld [vmem:[#allocation2 + $0x188] sm:$0xff]  ;;  %v877_v28 = vld [vmem:[#allocation2 + $0x2d8] sm:$0xff] }
 0x1de   :  { %v571_v32 = vmul.f32 %v3373_v26, %v542_v27  ;;  %v556_v33 = vpop.f32.mrb[5].mxu1  ;;  %v876_v27 = vld [vmem:[#allocation2 + $0x2d0] sm:$0xff] }
 0x1df   :  { %v2284_v34 = vpop.f32.mrb[8].mxu0  ;;  %v570_v19 = vmul.f32 %v3373_v26, %v3380_v30  ;;  %v878_v30 = vld [vmem:[#allocation2 + $0x2e0] sm:$0xff] }
 0x1e0   :  { %v582_v37 = vadd.f32 %v3378_v29, %v571_v32  ;;  %v552_v38 = vadd.f32 %v2325_v23, %v2284_v34  ;;  %v451_v39 = vpop.f32.mrb[9].mxu0  ;;  %v881_v34 = vld [vmem:[#allocation2 + $0x2f8] sm:$0xff] }
 0x1e1   :  { %v547_v40 = vadd.f32 %v546_v24, %v451_v39  ;;  %v581_v23 = vadd.f32 %v3378_v29, %v570_v19  ;;  %v2877_v24 = vpack.c.bf16 %v620_v22, %v619_v21  ;;  %v852_v39 = vld [vmem:[#allocation2 + $0x210] sm:$0xff] }
 0x1e2   :  { %v594_v41 = vmul.f32 0.2, %v582_v37  ;;  %v573_v42 = vmul.f32 %v3373_v26, %v552_v38  ;;  %vm588_vm10 = vcmp.gt.f32.partialorder %v582_v37, 0.0 }
 0x1e3   :  { %v572_v44 = vmul.f32 %v3373_v26, %v547_v40  ;;  %v2287_v45 = vpop.f32.mrb[10].mxu0  ;;  %v593_v25 = vmul.f32 0.2, %v581_v23  ;;  %vm587_vm15 = vcmp.gt.f32.partialorder %v581_v23, 0.0  ;;  %v853_v40 = vld [vmem:[#allocation2 + $0x218] sm:$0xff] }
 0x1e4   :  { %v562_v48 = vadd.f32 %v2328_v31, %v2287_v45  ;;  %v461_v49 = vpop.f32.mrb[11].mxu0  ;;  %v3386_v50 = vsel %vm588_vm10, %v582_v37, %v594_v41  ;;  %v584_v53 = vadd.f32 %v3378_v29, %v573_v42  ;;  %v879_v31 = vld [vmem:[#allocation2 + $0x2e8] sm:$0xff]  ;;  %v3427_v41 = vpack.c.bf16 %v853_v40, %v852_v39  ;;  %v1940_v42 = vld [vmem:[%s3604_s2 + $0x4] ss:$0 sm:$0xff] }
 0x1e5   :  { %v583_v51 = vadd.f32 %v3378_v29, %v572_v44  ;;  %v557_v52 = vadd.f32 %v556_v33, %v461_v49  ;;  %2362 = vmatmul.mubr.f32.vlgmr.msra.gmra.mrb[12].mxu0 %v3386_v50  ;;  %v2899_v32 = vpack.c.bf16 %v879_v31, %v878_v30  ;;  %v880_v33 = vld [vmem:[#allocation2 + $0x2f0] sm:$0xff]  ;;  %v883_v37 = vld [vmem:[#allocation2 + $0x308] sm:$0xff]  ;;  %v3436_v44 = vld [vmem:[%s3604_s2 + $0x5] ss:$0 sm:$0xff] }
 0x1e6   :  { %2857 = vmatpush3.bf16.msra.mxu0 %v2856_v43  ;;  %2364 = vmatprep.mubr.msk.f32.mxu0 %vm3256_vm9, %v3257_v8  ;;  %v575_v60 = vmul.f32 %v3373_v26, %v562_v48  ;;  %v596_v63 = vmul.f32 0.2, %v584_v53  ;;  %vm590_vm12 = vcmp.gt.f32.partialorder %v584_v53, 0.0  ;;  %v2903_v35 = vpack.c.bf16 %v881_v34, %v880_v33  ;;  %v857_v33 = vld [vmem:[#allocation2 + $0x238] sm:$0xff] }
 0x1e7   :  { %v574_v55 = vmul.f32 %v3373_v26, %v557_v52  ;;  %2858 = vmatprep.subr.bf16.mxu0 %v3255_v3  ;;  %vm589_vm11 = vcmp.gt.f32.partialorder %v583_v51, 0.0  ;;  %v595_v56 = vmul.f32 0.2, %v583_v51  ;;  %v599_v26 = vsel %vm587_vm15, %v581_v23, %v593_v25 }
 0x1e8   :  { %v586_v2 = vadd.f32 %v3378_v29, %v575_v60  ;;  %v602_v4 = vsel %vm590_vm12, %v584_v53, %v596_v63  ;;  %v2907_v38 = vpack.c.bf16 %v883_v37, %v882_v36  ;;  %v854_v63 = vld [vmem:[#allocation2 + $0x220] sm:$0xff] }
 0x1e9   :  { %v601_v59 = vsel %vm589_vm11, %v583_v51, %v595_v56  ;;  %v585_v61 = vadd.f32 %v3378_v29, %v574_v55  ;;  %v2895_v29 = vpack.c.bf16 %v877_v28, %v876_v27  ;;  %vm1547_vm11 = vcmask 236544  }
 0x1ea   :  { %2860 = vmatpush3.bf16.msra.mxu0 %v2859_v54  ;;  %v598_v12 = vmul.f32 0.2, %v586_v2  ;;  %vm592_vm14 = vcmp.gt.f32.partialorder %v586_v2, 0.0 }
 0x1eb   :  { %2365 = vmatmul.mubr.f32.gmra.mrb[14].mxu0 %v601_v59  ;;  %2861 = vmatprep.subr.bf16.mxu0 %v3255_v3  ;;  %v597_v6 = vmul.f32 0.2, %v585_v61  ;;  %vm591_vm13 = vcmp.gt.f32.partialorder %v585_v61, 0.0 }
 0x1ec   :  { %2367 = vmatprep.mubr.msk.f32.mxu0 %vm3256_vm9, %v3257_v8  ;;  %v604_v15 = vsel %vm592_vm14, %v586_v2, %v598_v12  ;;  %2896 = vmatprep.subr.bf16.mxu1 %v2895_v29 }
 0x1ed   :  { %v603_v10 = vsel %vm591_vm13, %v585_v61, %v597_v6  ;;  %2898 = vmatpush3.bf16.msra.mxu1 %v2895_v29 }
 0x1ee   :  { %2863 = vmatpush3.bf16.msra.mxu0 %v2862_v62  ;;  %2900 = vmatprep.subr.bf16.mxu1 %v2899_v32 }
 0x1ef   :  { %2368 = vmatmul.mubr.f32.gmra.mrb[16].mxu0 %v602_v4  ;;  %2864 = vmatprep.subr.bf16.mxu0 %v3255_v3 }
 0x1f0   :  { %2370 = vmatprep.mubr.msk.f32.mxu0 %vm3256_vm9, %v3257_v8 }
 0x1f1   :  { %2902 = vmatpush3.bf16.msra.mxu1 %v2899_v32  ;;  %v856_v32 = vld [vmem:[#allocation2 + $0x230] sm:$0xff] }
 0x1f2   :  { %2866 = vmatpush3.bf16.msra.mxu0 %v2865_v5  ;;  %2904 = vmatprep.subr.bf16.mxu1 %v2903_v35  ;;  %v855_v5 = vld [vmem:[#allocation2 + $0x228] sm:$0xff] }
 0x1f3   :  { %2371 = vmatmul.mubr.f32.gmra.mrb[18].mxu0 %v603_v10  ;;  %2867 = vmatprep.subr.bf16.mxu0 %v3255_v3 }
 0x1f4   :  { %2373 = vmatprep.mubr.msk.f32.mxu0 %vm3256_vm9, %v3257_v8 }
 0x1f5   :  { %2906 = vmatpush3.bf16.msra.mxu1 %v2903_v35 }
 0x1f6   :  { %2869 = vmatpush3.bf16.msra.mxu0 %v2868_v11  ;;  %2908 = vmatprep.subr.bf16.mxu1 %v2907_v38 }
 0x1f7   :  { %2374 = vmatmul.mubr.f32.gmra.mrb[20].mxu0 %v604_v15  ;;  %2870 = vmatprep.subr.bf16.mxu0 %v3255_v3 }
 0x1f8   :  { %2408 = vmatprep.mubr.msk.f32.mxu0 %vm3256_vm9, %v3257_v8 }
 0x1f9   :  { %2910 = vmatpush3.bf16.msra.mxu1 %v2907_v38 }
 0x1fa   :  { %2872 = vmatpush3.bf16.msra.mxu0 %v2871_v16  ;;  %2912 = vmatprep.subr.bf16.mxu1 %v3427_v41 }
 0x1fb   :  { %2873 = vmatprep.subr.bf16.mxu0 %v3255_v3 }
 0x1fe   :  { %2875 = vmatpush3.bf16.msra.mxu0 %v2874_v20  ;;  %v2915_v20 = vpack.c.bf16 %v855_v5, %v854_v63  ;;  %v864_v5 = vld [vmem:[#allocation2 + $0x270] sm:$0xff] }
 0x1ff   :  { %2876 = vmatprep.subr.bf16.mxu0 %v3255_v3 }
 0x202   :  { %2878 = vmatpush3.bf16.msra.mxu0 %v2877_v24 }
 0x203   :  { %3071 = vmatprep.subr.bf16.mxu0 %v3255_v3 }
 0x205   :  { %2409 = vmatmul.mubr.f32.vlgmr.msra.gmra.mrb[12].mxu0 %v599_v26 }
 0x206   :  { %2411 = vmatprep.mubr.msk.f32.mxu0 %vm3256_vm9, %v3257_v8 }
 0x209   :  { %2412 = vmatmul.mubr.f32.gmra.mrb[14].mxu0 %v3386_v50 }
 0x20a   :  { %2414 = vmatprep.mubr.msk.f32.mxu0 %vm3256_vm9, %v3257_v8 }
 0x20d   :  { %2415 = vmatmul.mubr.f32.gmra.mrb[16].mxu0 %v601_v59 }
 0x20e   :  { %2417 = vmatprep.mubr.msk.f32.mxu0 %vm3256_vm9, %v3257_v8 }
 0x211   :  { %2418 = vmatmul.mubr.f32.gmra.mrb[18].mxu0 %v602_v4 }
 0x212   :  { %2420 = vmatprep.mubr.msk.f32.mxu0 %vm3256_vm9, %v3257_v8 }
 0x215   :  { %2421 = vmatmul.mubr.f32.gmra.mrb[20].mxu0 %v603_v10 }
 0x216   :  { %2659 = vmatprep.mubr.msk.f32.mxu0 %vm3256_vm9, %v3257_v8 }
 0x2d8   :  { %v793_v43 = vpop.f32.mrb[12].mxu0 }
 0x2d9   :  { %v822_v45 = vmul.f32 %v1940_v42, %v793_v43  ;;  %v2410_v46 = vpop.f32.mrb[13].mxu0 }
 0x2db   :  { %v832_v47 = vadd.f32 %v3436_v44, %v822_v45 }
 0x2dc   :  { %v798_v48 = vpop.f32.mrb[14].mxu0 }
 0x2dd   :  { %vm837_vm1 = vcmp.gt.f32.partialorder %v832_v47, 0.0  ;;  %v842_v49 = vmul.f32 0.2, %v832_v47  ;;  %v823_v50 = vmul.f32 %v1940_v42, %v798_v48  ;;  %v2413_v51 = vpop.f32.mrb[15].mxu0 }
 0x2df   :  { %v3439_v52 = vsel %vm837_vm1, %v832_v47, %v842_v49  ;;  %v833_v53 = vadd.f32 %v3436_v44, %v823_v50  ;;  %v2919_v47 = vpack.c.bf16 %v857_v33, %v856_v32  ;;  %v858_v49 = vld [vmem:[#allocation2 + $0x240] sm:$0xff]  ;;  %v859_v50 = vld [vmem:[#allocation2 + $0x248] sm:$0xff]  ;;  %v1082_v32 = vld [vmem:[#allocation2 + $0x370] sm:$0xff] }
 0x2e0   :  { %v803_v54 = vpop.f32.mrb[16].mxu0  ;;  %v889_v58 = vrot.slane %v3439_v52, 1  ;;  %v1086_v59 = vrot.slane %v3439_v52, 2  ;;  %v1203_v60 = vrot.slane %v3439_v52, 3  ;;  %v1320_v0 = vrot.slane %v3439_v52, 4  ;;  %v1083_v33 = vld [vmem:[#allocation2 + $0x378] sm:$0xff] }
 0x2e1   :  { %vm838_vm3 = vcmp.gt.f32.partialorder %v833_v53, 0.0  ;;  %v843_v55 = vmul.f32 0.2, %v833_v53  ;;  %v824_v56 = vmul.f32 %v1940_v42, %v803_v54  ;;  %v2416_v57 = vpop.f32.mrb[17].mxu0  ;;  %v1439_v1 = vrot.slane %v3439_v52, 5 }
 0x2e3   :  { %v3445_v61 = vsel %vm838_vm3, %v833_v53, %v843_v55  ;;  %v834_v62 = vadd.f32 %v3436_v44, %v824_v56 }
 0x2e4   :  { %v808_v2 = vpop.f32.mrb[18].mxu0  ;;  %v890_v4 = vrot.slane %v3445_v61, 1  ;;  %v1087_v6 = vrot.slane %v3445_v61, 2  ;;  %v1204_v7 = vrot.slane %v3445_v61, 3  ;;  %v1321_v9 = vrot.slane %v3445_v61, 4 }
 0x2e5   :  { %vm839_vm7 = vcmp.gt.f32.partialorder %v834_v62, 0.0  ;;  %v844_v10 = vmul.f32 0.2, %v834_v62  ;;  %v825_v11 = vmul.f32 %v1940_v42, %v808_v2  ;;  %v2419_v12 = vpop.f32.mrb[19].mxu0  ;;  %v1440_v13 = vrot.slane %v3445_v61, 5  ;;  %v863_v2 = vld [vmem:[#allocation2 + $0x268] sm:$0xff] }
 0x2e6   :  { %v891_v14 = vsel %vm888_vm2, %v889_v58, %v890_v4  ;;  %v3457_v15 = vsel %vm46_vm0, %v1086_v59, %v1087_v6  ;;  %v3460_v16 = vsel %vm1202_vm5, %v1203_v60, %v1204_v7  ;;  %v3463_v17 = vsel %vm357_vm4, %v1320_v0, %v1321_v9  ;;  %v860_v59 = vld [vmem:[#allocation2 + $0x250] sm:$0xff]  ;;  %v861_v60 = vld [vmem:[#allocation2 + $0x258] sm:$0xff] }
 0x2e7   :  { %v3465_v18 = vsel %vm839_vm7, %v834_v62, %v844_v10  ;;  %v835_v19 = vadd.f32 %v3436_v44, %v825_v11  ;;  %2455 = vmatprep.mubr.f32.mxu1 %v891_v14  ;;  %v3469_v21 = vsel %vm1438_vm6, %v1439_v1, %v1440_v13  ;;  %v2923_v58 = vpack.c.bf16 %v859_v50, %v858_v49  ;;  %v862_v1 = vld [vmem:[#allocation2 + $0x260] sm:$0xff]  ;;  %v1070_v11 = vld [vmem:[#allocation2 + $0x310] sm:$0xff]  ;;  %v1071_v12 = vld [vmem:[#allocation2 + $0x318] sm:$0xff] }
 0x2e8   :  { %v813_v22 = vpop.f32.mrb[20].mxu0  ;;  %v892_v23 = vrot.slane %v3465_v18, 1  ;;  %v1089_v24 = vrot.slane %v3465_v18, 2  ;;  %v1206_v25 = vrot.slane %v3465_v18, 3  ;;  %v1323_v26 = vrot.slane %v3465_v18, 4  ;;  %v1072_v14 = vld [vmem:[#allocation2 + $0x320] sm:$0xff] }
 0x2e9   :  { %vm840_vm8 = vcmp.gt.f32.partialorder %v835_v19, 0.0  ;;  %v845_v27 = vmul.f32 0.2, %v835_v19  ;;  %v826_v28 = vmul.f32 %v1940_v42, %v813_v22  ;;  %v2422_v29 = vpop.f32.mrb[21].mxu0  ;;  %v1442_v30 = vrot.slane %v3465_v18, 5  ;;  %v1074_v22 = vld [vmem:[#allocation2 + $0x330] sm:$0xff] }
 0x2ea   :  { %v893_v31 = vsel %vm888_vm2, %v890_v4, %v892_v23  ;;  %v3478_v34 = vsel %vm46_vm0, %v1087_v6, %v1089_v24  ;;  %v3481_v35 = vsel %vm1202_vm5, %v1204_v7, %v1206_v25  ;;  %v3484_v36 = vsel %vm357_vm4, %v1321_v9, %v1323_v26  ;;  %v865_v6 = vld [vmem:[#allocation2 + $0x278] sm:$0xff]  ;;  %v866_v7 = vld [vmem:[#allocation2 + $0x280] sm:$0xff]  ;;  %v867_v9 = vld [vmem:[#allocation2 + $0x288] sm:$0xff] }
 0x2eb   :  { %v3486_v37 = vsel %vm840_vm8, %v835_v19, %v845_v27  ;;  %v836_v38 = vadd.f32 %v3436_v44, %v826_v28  ;;  %2456 = vmatmul.mubr.f32.vlgmr.msra.gmra.mrb[6].mxu1 %v893_v31  ;;  %v3490_v39 = vsel %vm1438_vm6, %v1440_v13, %v1442_v30  ;;  %v2927_v0 = vpack.c.bf16 %v861_v60, %v860_v59  ;;  %v1073_v19 = vld [vmem:[#allocation2 + $0x328] sm:$0xff]  ;;  %v1078_v28 = vld [vmem:[#allocation2 + $0x350] sm:$0xff]  ;;  %v1079_v29 = vld [vmem:[#allocation2 + $0x358] sm:$0xff] }
 0x2ec   :  { %2914 = vmatpush3.bf16.msra.mxu1 %v3427_v41  ;;  %v894_v40 = vrot.slane %v3486_v37, 1  ;;  %v1091_v42 = vrot.slane %v3486_v37, 2  ;;  %v1208_v43 = vrot.slane %v3486_v37, 3  ;;  %v1325_v45 = vrot.slane %v3486_v37, 4  ;;  %v1081_v31 = vld [vmem:[#allocation2 + $0x368] sm:$0xff] }
 0x2ed   :  { %vm841_vm10 = vcmp.gt.f32.partialorder %v836_v38, 0.0  ;;  %v846_v46 = vmul.f32 0.2, %v836_v38  ;;  %2916 = vmatprep.subr.bf16.mxu1 %v2915_v20  ;;  %v1444_v44 = vrot.slane %v3486_v37, 5  ;;  %v2931_v4 = vpack.c.bf16 %v863_v2, %v862_v1  ;;  %v1189_v49 = vld [vmem:[#allocation2 + $0x3a8] sm:$0xff]  ;;  %v1195_v1 = vld [vmem:[#allocation2 + $0x3d8] sm:$0xff] }
 0x2ee   :  { %v895_v48 = vsel %vm888_vm2, %v892_v23, %v894_v40  ;;  %v3502_v41 = vsel %vm46_vm0, %v1089_v24, %v1091_v42  ;;  %v3507_v51 = vsel %vm1202_vm5, %v1206_v25, %v1208_v43  ;;  %v3510_v53 = vsel %vm357_vm4, %v1323_v26, %v1325_v45  ;;  %v1075_v23 = vld [vmem:[#allocation2 + $0x338] sm:$0xff]  ;;  %v1076_v25 = vld [vmem:[#allocation2 + $0x340] sm:$0xff]  ;;  %v1077_v26 = vld [vmem:[#allocation2 + $0x348] sm:$0xff] }
 0x2ef   :  { %v851_v54 = vsel %vm841_vm10, %v836_v38, %v846_v46  ;;  %2458 = vmatprep.mubr.f32.mxu1 %v895_v48  ;;  %v3513_v55 = vsel %vm1438_vm6, %v1442_v30, %v1444_v44  ;;  %v2939_v10 = vpack.c.bf16 %v867_v9, %v866_v7  ;;  %v2943_v13 = vpack.c.bf16 %v1071_v12, %v1070_v11  ;;  %v1186_v46 = vld [vmem:[#allocation2 + $0x390] sm:$0xff]  ;;  %v1188_v48 = vld [vmem:[#allocation2 + $0x3a0] sm:$0xff]  ;;  %v1193_v59 = vld [vmem:[#allocation2 + $0x3c8] sm:$0xff] }
 0x2f0   :  { %2918 = vmatpush3.bf16.msra.mxu1 %v2915_v20  ;;  %v1327_v56 = vrot.slane %v851_v54, 4  ;;  %v1446_v57 = vrot.slane %v851_v54, 5  ;;  %v2947_v20 = vpack.c.bf16 %v1073_v19, %v1072_v14  ;;  %v2951_v24 = vpack.c.bf16 %v1075_v23, %v1074_v22  ;;  %v1190_v54 = vld [vmem:[#allocation2 + $0x3b0] sm:$0xff]  ;;  %v1196_v2 = vld [vmem:[#allocation2 + $0x3e0] sm:$0xff]  ;;  %v1201_v7 = vld [vmem:[#allocation2 + $0x408] sm:$0xff] }
 0x2f1   :  { %2459 = vmatmul.mubr.f32.gmra.mrb[8].mxu1 %v894_v40  ;;  %2920 = vmatprep.subr.bf16.mxu1 %v2919_v47  ;;  %v2955_v27 = vpack.c.bf16 %v1077_v26, %v1076_v25  ;;  %v2959_v30 = vpack.c.bf16 %v1079_v29, %v1078_v28  ;;  %v2967_v38 = vpack.c.bf16 %v1083_v33, %v1082_v32  ;;  %v1084_v40 = vld [vmem:[#allocation2 + $0x380] sm:$0xff]  ;;  %v1303_v9 = vld [vmem:[#allocation2 + $0x410] sm:$0xff]  ;;  %v1423_v32 = vld [vmem:[#allocation2 + $0x498] sm:$0xff]  ;;  %vm3258_vm0 = vmmov 1  }
 0x2f2   :  { %2493 = vmatprep.mubr.f32.mxu1 %v3439_v52  ;;  %v3517_v62 = vsel %vm357_vm4, %v1325_v45, %v1327_v56  ;;  %v3520_v63 = vsel %vm1438_vm6, %v1444_v44, %v1446_v57  ;;  %v2935_v52 = vpack.c.bf16 %v865_v6, %v864_v5  ;;  %v1085_v45 = vld [vmem:[#allocation2 + $0x388] sm:$0xff]  ;;  %v2979_v50 = vpack.c.bf16 %v1189_v49, %v1188_v48  ;;  %v1191_v56 = vld [vmem:[#allocation2 + $0x3b8] sm:$0xff]  ;;  %v1198_v5 = vld [vmem:[#allocation2 + $0x3f0] sm:$0xff] }
 0x2f3   :  { %v2983_v57 = vpack.c.bf16 %v1191_v56, %v1190_v54  ;;  %v1199_v6 = vld [vmem:[#allocation2 + $0x3f8] sm:$0xff]  ;;  %v1305_v12 = vld [vmem:[#allocation2 + $0x420] sm:$0xff]  ;;  %v1307_v19 = vld [vmem:[#allocation2 + $0x430] sm:$0xff] }
 0x2f4   :  { %2922 = vmatpush3.bf16.msra.mxu1 %v2919_v47  ;;  %v1187_v47 = vld [vmem:[#allocation2 + $0x398] sm:$0xff]  ;;  %v1309_v23 = vld [vmem:[#allocation2 + $0x440] sm:$0xff]  ;;  %v1311_v26 = vld [vmem:[#allocation2 + $0x450] sm:$0xff] }
 0x2f5   :  { %2924 = vmatprep.subr.bf16.mxu1 %v2923_v58  ;;  %v2975_v44 = vpack.c.bf16 %v1187_v47, %v1186_v46  ;;  %v1313_v28 = vld [vmem:[#allocation2 + $0x460] sm:$0xff]  ;;  %v1427_v46 = vld [vmem:[#allocation2 + $0x4b8] sm:$0xff]  ;;  %v1429_v48 = vld [vmem:[#allocation2 + $0x4c8] sm:$0xff] }
 0x2f6   :  { %v1431_v54 = vld [vmem:[#allocation2 + $0x4d8] sm:$0xff]  ;;  %vm3076_vm4 = vmpackc.low %vm1202_vm5, %vm3258_vm0 }
 0x2f8   :  { %2926 = vmatpush3.bf16.msra.mxu1 %v2923_v58  ;;  %v1192_v58 = vld [vmem:[#allocation2 + $0x3c0] sm:$0xff] }
 0x2f9   :  { %2928 = vmatprep.subr.bf16.mxu1 %v2927_v0  ;;  %v2987_v60 = vpack.c.bf16 %v1193_v59, %v1192_v58  ;;  %v1434_v58 = vld [vmem:[#allocation2 + $0x4f0] sm:$0xff]  ;;  %v1435_v59 = vld [vmem:[#allocation2 + $0x4f8] sm:$0xff] }
 0x2fc   :  { %2930 = vmatpush3.bf16.msra.mxu1 %v2927_v0  ;;  %v1194_v0 = vld [vmem:[#allocation2 + $0x3d0] sm:$0xff] }
 0x2fd   :  { %2932 = vmatprep.subr.bf16.mxu1 %v2931_v4 }
 0x300   :  { %2934 = vmatpush3.bf16.msra.mxu1 %v2931_v4 }
 0x301   :  { %2936 = vmatprep.subr.bf16.mxu1 %v2935_v52 }
 0x304   :  { %2938 = vmatpush3.bf16.msra.mxu1 %v2935_v52  ;;  %v1200_v52 = vld [vmem:[#allocation2 + $0x400] sm:$0xff] }
 0x305   :  { %2940 = vmatprep.subr.bf16.mxu1 %v2939_v10 }
 0x308   :  { %2942 = vmatpush3.bf16.msra.mxu1 %v2939_v10  ;;  %v1304_v10 = vld [vmem:[#allocation2 + $0x418] sm:$0xff] }
 0x309   :  { %2944 = vmatprep.subr.bf16.mxu1 %v2943_v13  ;;  %v3007_v11 = vpack.c.bf16 %v1304_v10, %v1303_v9  ;;  %v1630_v9 = vld [vmem:[#allocation2 + $0x538] sm:$0xff] }
 0x30b   :  { %2494 = vmatmul.mubr.f32.vlgmr.msra.gmra.mrb[6].mxu1 %v3445_v61  ;;  %v1080_v61 = vld [vmem:[#allocation2 + $0x360] sm:$0xff] }
 0x30c   :  { %2496 = vmatprep.mubr.f32.mxu1 %v3465_v18  ;;  %2946 = vmatpush3.bf16.msra.mxu1 %v2943_v13  ;;  %v2963_v18 = vpack.c.bf16 %v1081_v31, %v1080_v61  ;;  %v1306_v13 = vld [vmem:[#allocation2 + $0x428] sm:$0xff]  ;;  %v1316_v61 = vld [vmem:[#allocation2 + $0x478] sm:$0xff] }
 0x30d   :  { %2948 = vmatprep.subr.bf16.mxu1 %v2947_v20  ;;  %v3011_v14 = vpack.c.bf16 %v1306_v13, %v1305_v12  ;;  %v1318_v31 = vld [vmem:[#allocation2 + $0x488] sm:$0xff] }
 0x30e   :  { %v1632_v12 = vld [vmem:[#allocation2 + $0x548] sm:$0xff] }
 0x30f   :  { %2497 = vmatmul.mubr.f32.gmra.mrb[8].mxu1 %v3486_v37 }
 0x310   :  { %2950 = vmatpush3.bf16.msra.mxu1 %v2947_v20  ;;  %2531 = vmatprep.mubr.f32.mxu1 %v3457_v15  ;;  %v2971_v15 = vpack.c.bf16 %v1085_v45, %v1084_v40  ;;  %v1308_v20 = vld [vmem:[#allocation2 + $0x438] sm:$0xff]  ;;  %v1425_v40 = vld [vmem:[#allocation2 + $0x4a8] sm:$0xff] }
 0x311   :  { %2952 = vmatprep.subr.bf16.mxu1 %v2951_v24  ;;  %v3015_v22 = vpack.c.bf16 %v1308_v20, %v1307_v19  ;;  %v1634_v19 = vld [vmem:[#allocation2 + $0x558] sm:$0xff] }
 0x314   :  { %2954 = vmatpush3.bf16.msra.mxu1 %v2951_v24  ;;  %v1310_v24 = vld [vmem:[#allocation2 + $0x448] sm:$0xff] }
 0x315   :  { %2956 = vmatprep.subr.bf16.mxu1 %v2955_v27  ;;  %v3019_v25 = vpack.c.bf16 %v1310_v24, %v1309_v23  ;;  %v1636_v23 = vld [vmem:[#allocation2 + $0x568] sm:$0xff] }
 0x318   :  { %2958 = vmatpush3.bf16.msra.mxu1 %v2955_v27  ;;  %v1312_v27 = vld [vmem:[#allocation2 + $0x458] sm:$0xff] }
 0x319   :  { %2960 = vmatprep.subr.bf16.mxu1 %v2959_v30 }
 0x31c   :  { %2962 = vmatpush3.bf16.msra.mxu1 %v2959_v30  ;;  %v1315_v30 = vld [vmem:[#allocation2 + $0x470] sm:$0xff] }
 0x31d   :  { %2964 = vmatprep.subr.bf16.mxu1 %v2963_v18  ;;  %v3031_v37 = vpack.c.bf16 %v1316_v61, %v1315_v30  ;;  %v1717_v30 = vld [vmem:[#allocation2 + $0x590] sm:$0xff]  ;;  %v1718_v61 = vld [vmem:[#allocation2 + $0x598] sm:$0xff] }
 0x320   :  { %2966 = vmatpush3.bf16.msra.mxu1 %v2963_v18  ;;  %v1422_v18 = vld [vmem:[#allocation2 + $0x490] sm:$0xff] }
 0x321   :  { %2968 = vmatprep.subr.bf16.mxu1 %v2967_v38  ;;  %v3039_v33 = vpack.c.bf16 %v1423_v32, %v1422_v18  ;;  %v1719_v32 = vld [vmem:[#allocation2 + $0x5a0] sm:$0xff] }
 0x324   :  { %2970 = vmatpush3.bf16.msra.mxu1 %v2967_v38  ;;  %v1424_v38 = vld [vmem:[#allocation2 + $0x4a0] sm:$0xff] }
 0x325   :  { %2972 = vmatprep.subr.bf16.mxu1 %v2971_v15  ;;  %v3043_v45 = vpack.c.bf16 %v1425_v40, %v1424_v38  ;;  %v1721_v40 = vld [vmem:[#allocation2 + $0x5b0] sm:$0xff] }
 0x328   :  { %2974 = vmatpush3.bf16.msra.mxu1 %v2971_v15  ;;  %v1426_v15 = vld [vmem:[#allocation2 + $0x4b0] sm:$0xff] }
 0x329   :  { %2976 = vmatprep.subr.bf16.mxu1 %v2975_v44  ;;  %v3047_v47 = vpack.c.bf16 %v1427_v46, %v1426_v15  ;;  %v1723_v46 = vld [vmem:[#allocation2 + $0x5c0] sm:$0xff] }
 0x32b   :  { %2532 = vmatmul.mubr.f32.vlgmr.msra.gmra.mrb[6].mxu1 %v3478_v34  ;;  %v2991_v34 = vpack.c.bf16 %v1195_v1, %v1194_v0  ;;  %v1437_v0 = vld [vmem:[#allocation2 + $0x508] sm:$0xff] }
 0x32c   :  { %2534 = vmatprep.mubr.f32.mxu1 %v3502_v41  ;;  %2978 = vmatpush3.bf16.msra.mxu1 %v2975_v44  ;;  %v1197_v41 = vld [vmem:[#allocation2 + $0x3e8] sm:$0xff]  ;;  %v1428_v44 = vld [vmem:[#allocation2 + $0x4c0] sm:$0xff] }
 0x32d   :  { %2980 = vmatprep.subr.bf16.mxu1 %v2979_v50  ;;  %v2995_v4 = vpack.c.bf16 %v1197_v41, %v1196_v2  ;;  %v3051_v49 = vpack.c.bf16 %v1429_v48, %v1428_v44  ;;  %v1725_v48 = vld [vmem:[#allocation2 + $0x5d0] sm:$0xff] }
 0x32f   :  { %2535 = vmatmul.mubr.f32.gmra.mrb[8].mxu1 %v1091_v42  ;;  %v2999_v42 = vpack.c.bf16 %v1199_v6, %v1198_v5  ;;  %v1625_v5 = vld [vmem:[#allocation2 + $0x510] sm:$0xff]  ;;  %v1626_v6 = vld [vmem:[#allocation2 + $0x518] sm:$0xff] }
 0x330   :  { %2982 = vmatpush3.bf16.msra.mxu1 %v2979_v50  ;;  %2569 = vmatprep.mubr.f32.mxu1 %v3460_v16  ;;  %v3003_v16 = vpack.c.bf16 %v1201_v7, %v1200_v52  ;;  %v1430_v50 = vld [vmem:[#allocation2 + $0x4d0] sm:$0xff]  ;;  %v1628_v52 = vld [vmem:[#allocation2 + $0x528] sm:$0xff] }
 0x331   :  { %2984 = vmatprep.subr.bf16.mxu1 %v2983_v57  ;;  %v3055_v56 = vpack.c.bf16 %v1431_v54, %v1430_v50  ;;  %v1727_v54 = vld [vmem:[#allocation2 + $0x5e0] sm:$0xff] }
 0x334   :  { %2986 = vmatpush3.bf16.msra.mxu1 %v2983_v57  ;;  %v1433_v57 = vld [vmem:[#allocation2 + $0x4e8] sm:$0xff] }
 0x335   :  { %2988 = vmatprep.subr.bf16.mxu1 %v2987_v60 }
 0x338   :  { %2990 = vmatpush3.bf16.msra.mxu1 %v2987_v60  ;;  %v1436_v60 = vld [vmem:[#allocation2 + $0x500] sm:$0xff] }
 0x339   :  { %2992 = vmatprep.subr.bf16.mxu1 %v2991_v34 }
 0x33c   :  { %2994 = vmatpush3.bf16.msra.mxu1 %v2991_v34 }
 0x33d   :  { %2996 = vmatprep.subr.bf16.mxu1 %v2995_v4 }
 0x340   :  { %2998 = vmatpush3.bf16.msra.mxu1 %v2995_v4 }
 0x341   :  { %3000 = vmatprep.subr.bf16.mxu1 %v2999_v42 }
 0x344   :  { %3002 = vmatpush3.bf16.msra.mxu1 %v2999_v42 }
 0x345   :  { %3004 = vmatprep.subr.bf16.mxu1 %v3003_v16 }
 0x348   :  { %3006 = vmatpush3.bf16.msra.mxu1 %v3003_v16  ;;  %v1629_v16 = vld [vmem:[#allocation2 + $0x530] sm:$0xff] }
 0x349   :  { %3008 = vmatprep.subr.bf16.mxu1 %v3007_v11  ;;  %v3085_v10 = vpack.c.bf16 %v1630_v9, %v1629_v16  ;;  %v1816_v16 = vld [vmem:[#allocation2 + $0x648] sm:$0xff] }
 0x34b   :  { %2570 = vmatmul.mubr.f32.vlgmr.msra.gmra.mrb[6].mxu1 %v3481_v35  ;;  %v3023_v35 = vpack.c.bf16 %v1312_v27, %v1311_v26  ;;  %v1638_v26 = vld [vmem:[#allocation2 + $0x578] sm:$0xff] }
 0x34c   :  { %2572 = vmatprep.mubr.f32.mxu1 %v3507_v51  ;;  %3010 = vmatpush3.bf16.msra.mxu1 %v3007_v11  ;;  %v1314_v51 = vld [vmem:[#allocation2 + $0x468] sm:$0xff]  ;;  %v1631_v11 = vld [vmem:[#allocation2 + $0x540] sm:$0xff] }
 0x34d   :  { %3012 = vmatprep.subr.bf16.mxu1 %v3011_v14  ;;  %v3027_v29 = vpack.c.bf16 %v1314_v51, %v1313_v28  ;;  %v3088_v13 = vpack.c.bf16 %v1632_v12, %v1631_v11  ;;  %v1640_v28 = vld [vmem:[#allocation2 + $0x588] sm:$0xff]  ;;  %v1818_v11 = vld [vmem:[#allocation2 + $0x658] sm:$0xff] }
 0x34f   :  { %2573 = vmatmul.mubr.f32.gmra.mrb[8].mxu1 %v1208_v43  ;;  %v1317_v43 = vld [vmem:[#allocation2 + $0x480] sm:$0xff] }
 0x350   :  { %3014 = vmatpush3.bf16.msra.mxu1 %v3011_v14  ;;  %2607 = vmatprep.mubr.f32.mxu1 %v3463_v17  ;;  %v3035_v17 = vpack.c.bf16 %v1318_v31, %v1317_v43  ;;  %v1633_v14 = vld [vmem:[#allocation2 + $0x550] sm:$0xff] }
 0x351   :  { %3016 = vmatprep.subr.bf16.mxu1 %v3015_v22  ;;  %v3091_v20 = vpack.c.bf16 %v1634_v19, %v1633_v14  ;;  %v1821_v19 = vld [vmem:[#allocation2 + $0x670] sm:$0xff] }
 0x354   :  { %3018 = vmatpush3.bf16.msra.mxu1 %v3015_v22  ;;  %v1635_v22 = vld [vmem:[#allocation2 + $0x560] sm:$0xff] }
 0x355   :  { %3020 = vmatprep.subr.bf16.mxu1 %v3019_v25  ;;  %v3094_v24 = vpack.c.bf16 %v1636_v23, %v1635_v22  ;;  %v1823_v23 = vld [vmem:[#allocation2 + $0x680] sm:$0xff] }
 0x358   :  { %3022 = vmatpush3.bf16.msra.mxu1 %v3019_v25  ;;  %v1637_v25 = vld [vmem:[#allocation2 + $0x570] sm:$0xff] }
 0x359   :  { %3024 = vmatprep.subr.bf16.mxu1 %v3023_v35  ;;  %v3097_v27 = vpack.c.bf16 %v1638_v26, %v1637_v25  ;;  %v1946_v26 = vld [vmem:[%s3604_s2 + $0x8] ss:$0 sm:$0xff] }
 0x35c   :  { %3026 = vmatpush3.bf16.msra.mxu1 %v3023_v35  ;;  %v1639_v35 = vld [vmem:[#allocation2 + $0x580] sm:$0xff] }
 0x35d   :  { %3028 = vmatprep.subr.bf16.mxu1 %v3027_v29  ;;  %v3100_v51 = vpack.c.bf16 %v1640_v28, %v1639_v35 }
 0x360   :  { %3030 = vmatpush3.bf16.msra.mxu1 %v3027_v29  ;;  %v1942_v29 = vld [vmem:[%s3604_s2 + $0x6] ss:$0 sm:$0xff] }
 0x361   :  { %3032 = vmatprep.subr.bf16.mxu1 %v3031_v37 }
 0x364   :  { %3034 = vmatpush3.bf16.msra.mxu1 %v3031_v37 }
 0x365   :  { %3036 = vmatprep.subr.bf16.mxu1 %v3035_v17 }
 0x368   :  { %3038 = vmatpush3.bf16.msra.mxu1 %v3035_v17  ;;  %v3103_v17 = vpack.c.bf16 %v1718_v61, %v1717_v30 }
 0x369   :  { %3040 = vmatprep.subr.bf16.mxu1 %v3039_v33 }
 0x36b   :  { %2608 = vmatmul.mubr.f32.vlgmr.msra.gmra.mrb[6].mxu1 %v3484_v36  ;;  %v1432_v36 = vld [vmem:[#allocation2 + $0x4e0] sm:$0xff] }
 0x36c   :  { %2610 = vmatprep.mubr.f32.mxu1 %v3510_v53  ;;  %3042 = vmatpush3.bf16.msra.mxu1 %v3039_v33  ;;  %v3059_v53 = vpack.c.bf16 %v1433_v57, %v1432_v36  ;;  %v1720_v33 = vld [vmem:[#allocation2 + $0x5a8] sm:$0xff]  ;;  %v1729_v57 = vld [vmem:[#allocation2 + $0x5f0] sm:$0xff] }
 0x36d   :  { %3044 = vmatprep.subr.bf16.mxu1 %v3043_v45  ;;  %v3106_v38 = vpack.c.bf16 %v1720_v33, %v1719_v32 }
 0x36f   :  { %2611 = vmatmul.mubr.f32.gmra.mrb[8].mxu1 %v3517_v62  ;;  %v3063_v62 = vpack.c.bf16 %v1435_v59, %v1434_v58  ;;  %v1731_v59 = vld [vmem:[#allocation2 + $0x600] sm:$0xff] }
 0x370   :  { %3046 = vmatpush3.bf16.msra.mxu1 %v3043_v45  ;;  %2645 = vmatprep.mubr.f32.mxu1 %v3469_v21  ;;  %v3067_v21 = vpack.c.bf16 %v1437_v0, %v1436_v60  ;;  %v1722_v45 = vld [vmem:[#allocation2 + $0x5b8] sm:$0xff]  ;;  %v1945_v0 = vld [vmem:[%s3604_s2 + $0x7] ss:$0 sm:$0xff] }
 0x371   :  { %3048 = vmatprep.subr.bf16.mxu1 %v3047_v47  ;;  %v3109_v15 = vpack.c.bf16 %v1722_v45, %v1721_v40 }
 0x374   :  { %3050 = vmatpush3.bf16.msra.mxu1 %v3047_v47  ;;  %v1724_v47 = vld [vmem:[#allocation2 + $0x5c8] sm:$0xff] }
 0x375   :  { %3052 = vmatprep.subr.bf16.mxu1 %v3051_v49  ;;  %v3112_v44 = vpack.c.bf16 %v1724_v47, %v1723_v46 }
 0x378   :  { %3054 = vmatpush3.bf16.msra.mxu1 %v3051_v49  ;;  %v1726_v49 = vld [vmem:[#allocation2 + $0x5d8] sm:$0xff] }
 0x379   :  { %3056 = vmatprep.subr.bf16.mxu1 %v3055_v56  ;;  %v3115_v50 = vpack.c.bf16 %v1726_v49, %v1725_v48 }
 0x37c   :  { %3058 = vmatpush3.bf16.msra.mxu1 %v3055_v56  ;;  %v1728_v56 = vld [vmem:[#allocation2 + $0x5e8] sm:$0xff] }
 0x37d   :  { %3060 = vmatprep.subr.bf16.mxu1 %v3059_v53  ;;  %v3118_v36 = vpack.c.bf16 %v1728_v56, %v1727_v54 }
 0x380   :  { %3062 = vmatpush3.bf16.msra.mxu1 %v3059_v53  ;;  %v1730_v53 = vld [vmem:[#allocation2 + $0x5f8] sm:$0xff] }
 0x381   :  { %3064 = vmatprep.subr.bf16.mxu1 %v3063_v62  ;;  %v3121_v58 = vpack.c.bf16 %v1730_v53, %v1729_v57 }
 0x384   :  { %3066 = vmatpush3.bf16.msra.mxu1 %v3063_v62  ;;  %v1732_v62 = vld [vmem:[#allocation2 + $0x608] sm:$0xff] }
 0x385   :  { %3068 = vmatprep.subr.bf16.mxu1 %v3067_v21  ;;  %v3124_v60 = vpack.c.bf16 %v1732_v62, %v1731_v59 }
 0x388   :  { %3070 = vmatpush3.bf16.msra.mxu1 %v3067_v21  ;;  %v1809_v21 = vld [vmem:[#allocation2 + $0x610] sm:$0xff] }
 0x38b   :  { %2646 = vmatmul.mubr.f32.vlgmr.msra.gmra.mrb[6].mxu1 %v3490_v39  ;;  %v1541_v39 = vld [vmem:[%s3605_s3] sm:$0x3] }
 0x38c   :  { %2648 = vmatprep.mubr.f32.mxu1 %v3513_v55  ;;  %v3079_v55 = vpack.c.bf16 %v1626_v6, %v1625_v5  ;;  %v1811_v6 = vld [vmem:[#allocation2 + $0x620] sm:$0xff] }
 0x38f   :  { %2649 = vmatmul.mubr.f32.gmra.mrb[8].mxu1 %v3520_v63  ;;  %v1627_v63 = vld [vmem:[#allocation2 + $0x520] sm:$0xff] }
 0x390   :  { %v3082_v7 = vpack.c.bf16 %v1628_v52, %v1627_v63  ;;  %v1814_v63 = vld [vmem:[#allocation2 + $0x638] sm:$0xff] }
 0x45e   :  { %v2647_v1 = vpop.f32.mrb[6].mxu1 }
 0x45f   :  { %v1518_v34 = vpop.f32.mrb[7].mxu1 }
 0x460   :  { %v3072_v2 = vpack.c.bf16 %v2647_v1, %v1518_v34  ;;  %v1810_v1 = vld [vmem:[#allocation2 + $0x618] sm:$0xff] }
 0x462   :  { %v2650_v41 = vpop.f32.mrb[8].mxu1  ;;  %3073 = vmatpush3.bf16.msra.mxu0 %v3072_v2 }
 0x463   :  { %v1528_v4 = vpop.f32.mrb[9].mxu1  ;;  %3074 = vmatprep.subr.bf16.mxu0 %v3255_v3 }
 0x464   :  { %v3075_v42 = vpack.c.bf16 %v2650_v41, %v1528_v4  ;;  %v3127_v4 = vpack.c.bf16 %v1810_v1, %v1809_v21 }
 0x466   :  { %3077 = vmatpush3.bf16.msk.msra.mxu0 %vm3076_vm4, %v3075_v42  ;;  %v1812_v42 = vld [vmem:[#allocation2 + $0x628] sm:$0xff] }
 0x467   :  { %3078 = vmatprep.subr.bf16.mxu0 %v3255_v3 }
 0x469   :  { %2660 = vmatmul.mubr.msk.f32.vlgmr.msra.gmra.mrb[22].mxu0 %vm1547_vm11, %v1541_v39  ;;  %v3130_v39 = vpack.c.bf16 %v1812_v42, %v1811_v6 }
 0x46a   :  { %3080 = vmatpush3.bf16.msra.mxu0 %v3079_v55  ;;  %2694 = vmatprep.mubr.msk.f32.mxu0 %vm3256_vm9, %v3257_v8  ;;  %v1813_v55 = vld [vmem:[#allocation2 + $0x630] sm:$0xff] }
 0x46b   :  { %3081 = vmatprep.subr.bf16.mxu0 %v3255_v3  ;;  %v3133_v52 = vpack.c.bf16 %v1814_v63, %v1813_v55 }
 0x46e   :  { %3083 = vmatpush3.bf16.msra.mxu0 %v3082_v7  ;;  %v1815_v7 = vld [vmem:[#allocation2 + $0x640] sm:$0xff] }
 0x46f   :  { %3084 = vmatprep.subr.bf16.mxu0 %v3255_v3  ;;  %v3136_v9 = vpack.c.bf16 %v1816_v16, %v1815_v7 }
 0x472   :  { %3086 = vmatpush3.bf16.msra.mxu0 %v3085_v10  ;;  %v1817_v10 = vld [vmem:[#allocation2 + $0x650] sm:$0xff] }
 0x473   :  { %3087 = vmatprep.subr.bf16.mxu0 %v3255_v3  ;;  %v3139_v12 = vpack.c.bf16 %v1818_v11, %v1817_v10 }
 0x476   :  { %3089 = vmatpush3.bf16.msra.mxu0 %v3088_v13  ;;  %v1820_v13 = vld [vmem:[#allocation2 + $0x668] sm:$0xff] }
 0x477   :  { %3090 = vmatprep.subr.bf16.mxu0 %v3255_v3 }
 0x47a   :  { %3092 = vmatpush3.bf16.msra.mxu0 %v3091_v20  ;;  %v1822_v20 = vld [vmem:[#allocation2 + $0x678] sm:$0xff] }
 0x47b   :  { %3093 = vmatprep.subr.bf16.mxu0 %v3255_v3  ;;  %v3145_v22 = vpack.c.bf16 %v1822_v20, %v1821_v19 }
 0x47e   :  { %3095 = vmatpush3.bf16.msra.mxu0 %v3094_v24  ;;  %v1824_v24 = vld [vmem:[#allocation2 + $0x688] sm:$0xff] }
 0x47f   :  { %3096 = vmatprep.subr.bf16.mxu0 %v3255_v3  ;;  %v3148_v25 = vpack.c.bf16 %v1824_v24, %v1823_v23 }
 0x482   :  { %3098 = vmatpush3.bf16.msra.mxu0 %v3097_v27 }
 0x483   :  { %3099 = vmatprep.subr.bf16.mxu0 %v3255_v3 }
 0x486   :  { %3101 = vmatpush3.bf16.msra.mxu0 %v3100_v51 }
 0x487   :  { %3102 = vmatprep.subr.bf16.mxu0 %v3255_v3 }
 0x53c   :  { %v1620_v37 = vpop.f32.mrb[22].mxu0 }
 0x53d   :  { %v1621_v43 = vadd.f32 %v1942_v29, %v1620_v37  ;;  %v2661_v31 = vpop.f32.mrb[23].mxu0  ;;  %v1947_v29 = vld [vmem:[%s3604_s2 + $0x9] ss:$0 sm:$0xff] }
 0x53f   :  { %v1624_v18 = vmax.f32 %v1621_v43, 0.0 }
 0x541   :  { %2695 = vmatmul.mubr.f32.vlgmr.msra.gmra.mrb[24].mxu0 %v1624_v18 }
 0x542   :  { %3104 = vmatpush3.bf16.msra.mxu0 %v3103_v17  ;;  %2729 = vmatprep.mubr.msk.f32.mxu0 %vm3256_vm9, %v3257_v8 }
 0x543   :  { %3105 = vmatprep.subr.bf16.mxu0 %v3255_v3 }
 0x546   :  { %3107 = vmatpush3.bf16.msra.mxu0 %v3106_v38 }
 0x547   :  { %3108 = vmatprep.subr.bf16.mxu0 %v3255_v3 }
 0x54a   :  { %3110 = vmatpush3.bf16.msra.mxu0 %v3109_v15 }
 0x54b   :  { %3111 = vmatprep.subr.bf16.mxu0 %v3255_v3 }
 0x54e   :  { %3113 = vmatpush3.bf16.msra.mxu0 %v3112_v44 }
 0x54f   :  { %3114 = vmatprep.subr.bf16.mxu0 %v3255_v3 }
 0x552   :  { %3116 = vmatpush3.bf16.msra.mxu0 %v3115_v50 }
 0x553   :  { %3117 = vmatprep.subr.bf16.mxu0 %v3255_v3 }
 0x556   :  { %3119 = vmatpush3.bf16.msra.mxu0 %v3118_v36 }
 0x557   :  { %3120 = vmatprep.subr.bf16.mxu0 %v3255_v3 }
 0x55a   :  { %3122 = vmatpush3.bf16.msra.mxu0 %v3121_v58 }
 0x55b   :  { %3123 = vmatprep.subr.bf16.mxu0 %v3255_v3 }
 0x55e   :  { %3125 = vmatpush3.bf16.msra.mxu0 %v3124_v60 }
 0x55f   :  { %3126 = vmatprep.subr.bf16.mxu0 %v3255_v3 }
 0x614   :  { %v1712_v34 = vpop.f32.mrb[24].mxu0 }
 0x615   :  { %v1713_v2 = vadd.f32 %v1945_v0, %v1712_v34  ;;  %v2696_v41 = vpop.f32.mrb[25].mxu0 }
 0x617   :  { %v1716_v5 = vmax.f32 %v1713_v2, 0.0 }
 0x619   :  { %2730 = vmatmul.mubr.f32.vlgmr.msra.gmra.mrb[26].mxu0 %v1716_v5 }
 0x61a   :  { %3128 = vmatpush3.bf16.msra.mxu0 %v3127_v4  ;;  %2764 = vmatprep.mubr.msk.f32.mxu0 %vm3256_vm9, %v3257_v8  ;;  %v1819_v8 = vld [vmem:[#allocation2 + $0x660] sm:$0xff] }
 0x61b   :  { %3129 = vmatprep.subr.bf16.mxu0 %v3255_v3  ;;  %v3142_v14 = vpack.c.bf16 %v1820_v13, %v1819_v8 }
 0x61e   :  { %3131 = vmatpush3.bf16.msra.mxu0 %v3130_v39 }
 0x61f   :  { %3132 = vmatprep.subr.bf16.mxu0 %v3255_v3 }
 0x622   :  { %3134 = vmatpush3.bf16.msra.mxu0 %v3133_v52 }
 0x623   :  { %3135 = vmatprep.subr.bf16.mxu0 %v3255_v3 }
 0x626   :  { %3137 = vmatpush3.bf16.msra.mxu0 %v3136_v9 }
 0x627   :  { %3138 = vmatprep.subr.bf16.mxu0 %v3255_v3 }
 0x62a   :  { %3140 = vmatpush3.bf16.msra.mxu0 %v3139_v12 }
 0x62b   :  { %3141 = vmatprep.subr.bf16.mxu0 %v3255_v3 }
 0x62e   :  { %3143 = vmatpush3.bf16.msra.mxu0 %v3142_v14 }
 0x62f   :  { %3144 = vmatprep.subr.bf16.mxu0 %v3255_v3 }
 0x632   :  { %3146 = vmatpush3.bf16.msra.mxu0 %v3145_v22 }
 0x633   :  { %3147 = vmatprep.subr.bf16.mxu0 %v3255_v3 }
 0x636   :  { %3149 = vmatpush3.bf16.msra.mxu0 %v3148_v25 }
 0x6ec   :  { %v1804_v27 = vpop.f32.mrb[26].mxu0 }
 0x6ed   :  { %v1805_v35 = vadd.f32 %v1946_v26, %v1804_v27  ;;  %v2731_v28 = vpop.f32.mrb[27].mxu0 }
 0x6ef   :  { %v1808_v51 = vmax.f32 %v1805_v35, 0.0 }
 0x6f1   :  { %2765 = vmatmul.mubr.f32.vlgmr.msra.gmra.mrb[28].mxu0 %v1808_v51 }
 0x7c4   :  { %v1896_v30 = vpop.f32.mrb[28].mxu0 }
 0x7c5   :  { %v1897_v61 = vadd.f32 %v1947_v29, %v1896_v30  ;;  %v2766_v3 = vpop.f32.mrb[29].mxu0 }
 0x7c7   :  { %v1948_v37 = vmul.f32 -1.442695, %v1897_v61 }
 0x7c9   :  { %3200 = vpow2.f32 %v1948_v37 }
 0x7d3   :  { %v3201_v43 = vpop.eup %3200 }
 0x7d4   :  { %v1903_v31 = vadd.f32 1.0, %v3201_v43 }
 0x7d6   :  { %3202 = vrcp.f32 %v1903_v31 }
 0x7e0   :  { %v3203_v17 = vpop.eup %3202 }
 0x7e1   :  { %1906 = vst [vmem:[#allocation5] sm:$0x3] %v3203_v17 }
 0x7e2   :  { %3237 = shalt.err (!%p3234_p12)
}
 0x7e3   :  { %s3238_s11 = scalar_lea.hbm %s3606_s4, 32 }
 0x7e4   :  { %p3239_p13 = scmp.ne.s32.totalorder %s3606_s4, %s3238_s11  ;;  %p3242_p0 = scmp.lt.u32.totalorder %s3238_s11, %s3606_s4 }
 0x7e6   :  { %p3244_p1 = pnand %p3242_p0, %p3239_p13 }
 0x7e8   :  { %3247 = shalt.err (!%p3244_p1)
}
 0x7e9   :  { %1916 = dma.vmem_to_hbm [thread:$0]  %s1914_s1, 32, %s3606_s4, [#allocation4]  }
 0x7ea   :  { %3250 = dma.done.wait [#allocation4], 32  }
 0x7eb   :  { %3251 = vsyncadd [#allocation4], 4294967264 }
 0x7ec   :  { %1920 = vsyncpa [#allocation3], 1 }
 0x7ed   :  { %1921 = vsyncpa [#allocation4], 1 }

</bundles_post_ra>
